<compile_context>
chip_gen: v7x
topology: tpu7x:2x2x1
jax: 0.10.0
libtpu: 0.0.40
codegen_flags: <defaults>
</compile_context>

<pallas_src>
import math
from functools import partial

import jax
import jax.numpy as jnp
from jax import lax
from jax.experimental import pallas as pl
from jax.experimental.pallas import tpu as pltpu


def _round_up(v, m):
    return ((v + m - 1) // m) * m


def _lstm_recurrence_kernel(gx_ref, whh_t_ref, y_ref, hN_ref, cN_ref,
                            h_scr, c_scr, *, seq_len, needs_mask):
    """One grid step == T_BLK timesteps of the LSTM recurrence.

    gx_ref:     (T_BLK, Bp, 4*Hp)  precomputed x @ W_ih^T + (b_ih + b_hh), f32
    whh_t_ref:  (Hp, 4*Hp)         recurrent weights (resident in VMEM)
    y_ref:      (T_BLK, Bp, Hp)    per-step hidden outputs
    hN_ref/cN_ref: (Bp, Hp)        final state (written on last block only)
    h_scr/c_scr:   (Bp, Hp) f32    state carried across grid steps
    """
    blk = pl.program_id(0)
    t_blk = gx_ref.shape[0]
    hp = h_scr.shape[-1]

    # state = None path: zero-init on the very first block.
    @pl.when(blk == 0)
    def _():
        h_scr[...] = jnp.zeros_like(h_scr)
        c_scr[...] = jnp.zeros_like(c_scr)

    whh_t = whh_t_ref[...]

    def step(tt, carry):
        h, c = carry
        # Only the recurrent matmul lives inside the sequential loop.
        gates = gx_ref[tt] + jnp.dot(h, whh_t, preferred_element_type=jnp.float32)
        # torch.lstm_cell gate order: i, f, g, o (chunks of Hp, lane-aligned).
        i_g = jax.nn.sigmoid(gates[:, 0 * hp:1 * hp])
        f_g = jax.nn.sigmoid(gates[:, 1 * hp:2 * hp])
        g_g = jnp.tanh(gates[:, 2 * hp:3 * hp])
        o_g = jax.nn.sigmoid(gates[:, 3 * hp:4 * hp])
        c_new = f_g * c + i_g * g_g
        h_new = o_g * jnp.tanh(c_new)
        if needs_mask:  # static: only emitted when seq_len % T_BLK != 0
            valid = (blk * t_blk + tt) < seq_len
            h_new = jnp.where(valid, h_new, h)
            c_new = jnp.where(valid, c_new, c)
        y_ref[tt] = h_new.astype(y_ref.dtype)
        return (h_new, c_new)

    h_fin, c_fin = lax.fori_loop(0, t_blk, step, (h_scr[...], c_scr[...]),
                                 unroll=True)
    h_scr[...] = h_fin
    c_scr[...] = c_fin

    # Final state: resident outputs, write only once on the last block.
    @pl.when(blk == pl.num_programs(0) - 1)
    def _():
        hN_ref[...] = h_fin.astype(hN_ref.dtype)
        cN_ref[...] = c_fin.astype(cN_ref.dtype)


def lstm_layer_forward(x, w_ih, w_hh, b_ih, b_hh, *, t_blk=8):
    """x: (S, B, I); w_ih: (4H, I); w_hh: (4H, H); b_ih/b_hh: (4H,).

    Returns (y, (h_n, c_n)) matching LSTMLayer.forward with state=None.
    """
    S, B, I = x.shape
    H4 = w_ih.shape[0]
    H = H4 // 4

    LANE, SUBLANE = 128, 8
    Hp = _round_up(H, LANE)          # lane-aligned per-gate width
    Bp = _round_up(B, SUBLANE)       # sublane-aligned batch
    t_blk = max(1, min(t_blk, S))
    S_pad = _round_up(S, t_blk)
    needs_mask = (S_pad != S)
    f32 = jnp.float32

    # ---- Pad weights per gate so every gate occupies a 128-aligned lane slab.
    #      Padded rows/cols are zero => padded h/c lanes stay exactly 0.
    w_ih_p = jnp.zeros((4, Hp, I), f32).at[:, :H, :].set(
        w_ih.reshape(4, H, I).astype(f32))
    w_hh_p = jnp.zeros((4, Hp, Hp), f32).at[:, :H, :H].set(
        w_hh.reshape(4, H, H).astype(f32))
    b_p = jnp.zeros((4, Hp), f32).at[:, :H].set(
        (b_ih + b_hh).reshape(4, H).astype(f32))

    wih_t = w_ih_p.reshape(4 * Hp, I).T        # (I, 4Hp)
    whh_t = w_hh_p.reshape(4 * Hp, Hp).T       # (Hp, 4Hp), kernel-resident
    bias_row = b_p.reshape(1, 4 * Hp)

    # ---- Hoisted input projection: one big matmul outside the serial loop.
    x_p = jnp.zeros((S_pad, Bp, I), f32).at[:S, :B, :].set(x.astype(f32))
    gates_x = (jnp.dot(x_p.reshape(S_pad * Bp, I), wih_t,
                       precision=lax.Precision.HIGHEST) + bias_row)
    gates_x = gates_x.reshape(S_pad, Bp, 4 * Hp)

    n_blocks = S_pad // t_blk

    grid_spec = pltpu.PrefetchScalarGridSpec(
        num_scalar_prefetch=0,
        grid=(n_blocks,),
        in_specs=[
            pl.BlockSpec((t_blk, Bp, 4 * Hp), lambda t: (t, 0, 0)),   # gates_x
            # TODO(synk): for large H / v7x, pass W_hh^T in bf16 and request
            # single-buffering (pipeline_mode=pl.Buffered(1)) to halve VMEM.
            pl.BlockSpec((Hp, 4 * Hp), lambda t: (0, 0)),             # W_hh^T
        ],
        out_specs=[
            pl.BlockSpec((t_blk, Bp, Hp), lambda t: (t, 0, 0)),       # y block
            pl.BlockSpec((Bp, Hp), lambda t: (0, 0)),                 # h_n
            pl.BlockSpec((Bp, Hp), lambda t: (0, 0)),                 # c_n
        ],
        scratch_shapes=[
            pltpu.VMEM((Bp, Hp), f32),     # h state (persists across blocks)
            pltpu.VMEM((Bp, Hp), f32),     # c state
        ],
    )

    flops = 2 * S_pad * Bp * Hp * (4 * Hp) + 10 * S_pad * Bp * (4 * Hp)
    transcendentals = 5 * S_pad * Bp * Hp
    bytes_accessed = 4 * (gates_x.size + whh_t.size
                          + S_pad * Bp * Hp + 2 * Bp * Hp)

    y_pad, h_n, c_n = pl.pallas_call(
        partial(_lstm_recurrence_kernel, seq_len=S, needs_mask=needs_mask),
        out_shape=(
            jax.ShapeDtypeStruct((S_pad, Bp, Hp), x.dtype),
            jax.ShapeDtypeStruct((Bp, Hp), x.dtype),
            jax.ShapeDtypeStruct((Bp, Hp), x.dtype),
        ),
        grid_spec=grid_spec,
        compiler_params=pltpu.CompilerParams(
            dimension_semantics=("arbitrary",)),       # time is sequential
        cost_estimate=pl.CostEstimate(
            flops=flops, transcendentals=transcendentals,
            bytes_accessed=bytes_accessed),
    )(gates_x, whh_t)

    # Strip batch / hidden padding.
    return y_pad[:S, :B, :H], (h_n[:B, :H], c_n[:B, :H])


def lstm_layer_reference(x, w_ih, w_hh, b_ih, b_hh):
    """Pure-JAX reference (mirrors torch.lstm_cell with state=None)."""
    S, B, I = x.shape
    H = w_hh.shape[1]
    h0 = jnp.zeros((B, H), jnp.float32)
    c0 = jnp.zeros((B, H), jnp.float32)

    def step(carry, x_t):
        h, c = carry
        gates = (jnp.dot(x_t, w_ih.T, precision=lax.Precision.HIGHEST) + b_ih
                 + jnp.dot(h, w_hh.T, precision=lax.Precision.HIGHEST) + b_hh)
        i_g = jax.nn.sigmoid(gates[:, 0 * H:1 * H])
        f_g = jax.nn.sigmoid(gates[:, 1 * H:2 * H])
        g_g = jnp.tanh(gates[:, 2 * H:3 * H])
        o_g = jax.nn.sigmoid(gates[:, 3 * H:4 * H])
        c_new = f_g * c + i_g * g_g
        h_new = o_g * jnp.tanh(c_new)
        return (h_new, c_new), h_new

    (h_n, c_n), ys = lax.scan(step, (h0, c0), x.astype(jnp.float32))
    return ys, (h_n, c_n)


if __name__ == "__main__":
    seq_len, batch, input_size, hidden = 8, 4, 16, 32

    key = jax.random.PRNGKey(0)
    kx, kwi, kwh, kbi, kbh = jax.random.split(key, 5)

    # Deterministic parameter init mimicking reset_parameters(): U(-stdv, stdv)
    stdv = 1.0 / math.sqrt(hidden)
    w_ih = jax.random.uniform(kwi, (4 * hidden, input_size), jnp.float32, -stdv, stdv)
    w_hh = jax.random.uniform(kwh, (4 * hidden, hidden), jnp.float32, -stdv, stdv)
    b_ih = jax.random.uniform(kbi, (4 * hidden,), jnp.float32, -stdv, stdv)
    b_hh = jax.random.uniform(kbh, (4 * hidden,), jnp.float32, -stdv, stdv)

    x = jax.random.normal(kx, (seq_len, batch, input_size), jnp.float32)

    y, (h_n, c_n) = lstm_layer_forward(x, w_ih, w_hh, b_ih, b_hh)
    jax.block_until_ready((y, h_n, c_n))

    y_ref, (h_ref, c_ref) = lstm_layer_reference(x, w_ih, w_hh, b_ih, b_hh)
    assert y.shape == (seq_len, batch, hidden)
    assert h_n.shape == (batch, hidden) and c_n.shape == (batch, hidden)
    assert jnp.allclose(y, y_ref, atol=1e-4, rtol=1e-4)
    assert jnp.allclose(h_n, h_ref, atol=1e-4, rtol=1e-4)
    assert jnp.allclose(c_n, c_ref, atol=1e-4, rtol=1e-4)

    print("KERNEL_OK")
</pallas_src>

<mosaic_0001>
module attributes {stable_mosaic.version = 11 : i64} {
  func.func @_lstm_recurrence_kernel(%arg0: i32, %arg1: memref<8x8x512xf32, #tpu.memory_space<vmem>>, %arg2: memref<128x512xf32, #tpu.memory_space<vmem>>, %arg3: memref<8x8x128xf32, #tpu.memory_space<vmem>>, %arg4: memref<8x128xf32, #tpu.memory_space<vmem>>, %arg5: memref<8x128xf32, #tpu.memory_space<vmem>>, %arg6: memref<8x128xf32, #tpu.memory_space<vmem>>, %arg7: memref<8x128xf32, #tpu.memory_space<vmem>>) attributes {dimension_semantics = [#tpu.dimension_semantics<arbitrary>], iteration_bounds = array<i64: 1>, scalar_prefetch = 0 : i64, scratch_operands = 2 : i64, tpu.core_type = #tpu.core_type<tc>, window_params = [{transform_indices = @transform_0, window_bounds = array<i64: 8, 8, 512>}, {pipeline_mode = #tpu.pipeline_mode<synchronous>, transform_indices = @transform_1, window_bounds = array<i64: 128, 512>}, {transform_indices = @transform_2, window_bounds = array<i64: 8, 8, 128>}, {pipeline_mode = #tpu.pipeline_mode<synchronous>, transform_indices = @transform_3, window_bounds = array<i64: 8, 128>}, {pipeline_mode = #tpu.pipeline_mode<synchronous>, transform_indices = @transform_4, window_bounds = array<i64: 8, 128>}]} {
    %c0_i32 = arith.constant 0 : i32
    %0 = arith.cmpi eq, %arg0, %c0_i32 : i32
    %1 = arith.extui %0 : i1 to i32
    %c0_i32_0 = arith.constant 0 : i32
    %2 = arith.cmpi ne, %1, %c0_i32_0 : i32
    scf.if %2 {
      %cst_76 = arith.constant 0.000000e+00 : f32
      %283 = vector.broadcast %cst_76 : f32 to vector<8x128xf32>
      %c0_77 = arith.constant 0 : index
      %c0_78 = arith.constant 0 : index
      %284 = vector.load %arg6[%c0_77, %c0_78] : memref<8x128xf32, #tpu.memory_space<vmem>>, vector<8x128xf32>
      tpu.vector_store %arg6[%c0_77, %c0_78], %283 {strides = array<i32>} : memref<8x128xf32, #tpu.memory_space<vmem>>, vector<8x128xf32>,
      %cst_79 = arith.constant 0.000000e+00 : f32
      %285 = vector.broadcast %cst_79 : f32 to vector<8x128xf32>
      %c0_80 = arith.constant 0 : index
      %c0_81 = arith.constant 0 : index
      %286 = vector.load %arg7[%c0_80, %c0_81] : memref<8x128xf32, #tpu.memory_space<vmem>>, vector<8x128xf32>
      tpu.vector_store %arg7[%c0_80, %c0_81], %285 {strides = array<i32>} : memref<8x128xf32, #tpu.memory_space<vmem>>, vector<8x128xf32>,
    } else {
    }
    %c0 = arith.constant 0 : index
    %c0_1 = arith.constant 0 : index
    %3 = vector.load %arg2[%c0, %c0_1] : memref<128x512xf32, #tpu.memory_space<vmem>>, vector<128x512xf32>
    %c0_2 = arith.constant 0 : index
    %c0_3 = arith.constant 0 : index
    %4 = vector.load %arg6[%c0_2, %c0_3] : memref<8x128xf32, #tpu.memory_space<vmem>>, vector<8x128xf32>
    %c0_4 = arith.constant 0 : index
    %c0_5 = arith.constant 0 : index
    %5 = vector.load %arg7[%c0_4, %c0_5] : memref<8x128xf32, #tpu.memory_space<vmem>>, vector<8x128xf32>
    %c0_i32_6 = arith.constant 0 : i32
    %6 = arith.index_cast %c0_i32_6 : i32 to index
    %c0_7 = arith.constant 0 : index
    %c0_8 = arith.constant 0 : index
    %7 = vector.load %arg1[%6, %c0_7, %c0_8] : memref<8x8x512xf32, #tpu.memory_space<vmem>>, vector<1x8x512xf32>
    %8 = vector.shape_cast %7 : vector<1x8x512xf32> to vector<8x512xf32>
    %cst = arith.constant dense<0.000000e+00> : vector<8x512xf32>
    %9 = tpu.matmul %4, %3, %cst {dimension_numbers = #tpu.dot_dimension_numbers<[1], [0], [0], [1], [0, 0, 1, 1], [], []>} : vector<8x128xf32>, vector<128x512xf32>, vector<8x512xf32> -> vector<8x512xf32>
    %10 = arith.addf %8, %9 : vector<8x512xf32>
    %11 = vector.extract_strided_slice %10 {offsets = [0, 0], sizes = [8, 128], strides = [1, 1]} : vector<8x512xf32> to vector<8x128xf32>
    %12 = arith.negf %11 : vector<8x128xf32>
    %13 = math.exp %12 : vector<8x128xf32>
    %cst_9 = arith.constant 1.000000e+00 : f32
    %14 = vector.broadcast %cst_9 : f32 to vector<8x128xf32>
    %15 = arith.addf %14, %13 : vector<8x128xf32>
    %16 = arith.divf %14, %15 : vector<8x128xf32>
    %17 = vector.extract_strided_slice %10 {offsets = [0, 128], sizes = [8, 128], strides = [1, 1]} : vector<8x512xf32> to vector<8x128xf32>
    %18 = arith.negf %17 : vector<8x128xf32>
    %19 = math.exp %18 : vector<8x128xf32>
    %cst_10 = arith.constant 1.000000e+00 : f32
    %20 = vector.broadcast %cst_10 : f32 to vector<8x128xf32>
    %21 = arith.addf %20, %19 : vector<8x128xf32>
    %22 = arith.divf %20, %21 : vector<8x128xf32>
    %23 = vector.extract_strided_slice %10 {offsets = [0, 256], sizes = [8, 128], strides = [1, 1]} : vector<8x512xf32> to vector<8x128xf32>
    %24 = math.tanh %23 : vector<8x128xf32>
    %25 = vector.extract_strided_slice %10 {offsets = [0, 384], sizes = [8, 128], strides = [1, 1]} : vector<8x512xf32> to vector<8x128xf32>
    %26 = arith.negf %25 : vector<8x128xf32>
    %27 = math.exp %26 : vector<8x128xf32>
    %cst_11 = arith.constant 1.000000e+00 : f32
    %28 = vector.broadcast %cst_11 : f32 to vector<8x128xf32>
    %29 = arith.addf %28, %27 : vector<8x128xf32>
    %30 = arith.divf %28, %29 : vector<8x128xf32>
    %31 = arith.mulf %22, %5 : vector<8x128xf32>
    %32 = arith.mulf %16, %24 : vector<8x128xf32>
    %33 = arith.addf %31, %32 : vector<8x128xf32>
    %34 = math.tanh %33 : vector<8x128xf32>
    %35 = arith.mulf %30, %34 : vector<8x128xf32>
    %36 = arith.index_cast %c0_i32_6 : i32 to index
    %c0_12 = arith.constant 0 : index
    %c0_13 = arith.constant 0 : index
    %37 = vector.load %arg3[%36, %c0_12, %c0_13] : memref<8x8x128xf32, #tpu.memory_space<vmem>>, vector<1x8x128xf32>
    %38 = vector.shape_cast %37 : vector<1x8x128xf32> to vector<8x128xf32>
    %39 = vector.shape_cast %35 : vector<8x128xf32> to vector<1x8x128xf32>
    tpu.vector_store %arg3[%36, %c0_12, %c0_13], %39 {strides = array<i32>} : memref<8x8x128xf32, #tpu.memory_space<vmem>>, vector<1x8x128xf32>,
    %c1_i32 = arith.constant 1 : i32
    %40 = arith.index_cast %c1_i32 : i32 to index
    %c0_14 = arith.constant 0 : index
    %c0_15 = arith.constant 0 : index
    %41 = vector.load %arg1[%40, %c0_14, %c0_15] : memref<8x8x512xf32, #tpu.memory_space<vmem>>, vector<1x8x512xf32>
    %42 = vector.shape_cast %41 : vector<1x8x512xf32> to vector<8x512xf32>
    %cst_16 = arith.constant dense<0.000000e+00> : vector<8x512xf32>
    %43 = tpu.matmul %35, %3, %cst_16 {dimension_numbers = #tpu.dot_dimension_numbers<[1], [0], [0], [1], [0, 0, 1, 1], [], []>} : vector<8x128xf32>, vector<128x512xf32>, vector<8x512xf32> -> vector<8x512xf32>
    %44 = arith.addf %42, %43 : vector<8x512xf32>
    %45 = vector.extract_strided_slice %44 {offsets = [0, 0], sizes = [8, 128], strides = [1, 1]} : vector<8x512xf32> to vector<8x128xf32>
    %46 = arith.negf %45 : vector<8x128xf32>
    %47 = math.exp %46 : vector<8x128xf32>
    %cst_17 = arith.constant 1.000000e+00 : f32
    %48 = vector.broadcast %cst_17 : f32 to vector<8x128xf32>
    %49 = arith.addf %48, %47 : vector<8x128xf32>
    %50 = arith.divf %48, %49 : vector<8x128xf32>
    %51 = vector.extract_strided_slice %44 {offsets = [0, 128], sizes = [8, 128], strides = [1, 1]} : vector<8x512xf32> to vector<8x128xf32>
    %52 = arith.negf %51 : vector<8x128xf32>
    %53 = math.exp %52 : vector<8x128xf32>
    %cst_18 = arith.constant 1.000000e+00 : f32
    %54 = vector.broadcast %cst_18 : f32 to vector<8x128xf32>
    %55 = arith.addf %54, %53 : vector<8x128xf32>
    %56 = arith.divf %54, %55 : vector<8x128xf32>
    %57 = vector.extract_strided_slice %44 {offsets = [0, 256], sizes = [8, 128], strides = [1, 1]} : vector<8x512xf32> to vector<8x128xf32>
    %58 = math.tanh %57 : vector<8x128xf32>
    %59 = vector.extract_strided_slice %44 {offsets = [0, 384], sizes = [8, 128], strides = [1, 1]} : vector<8x512xf32> to vector<8x128xf32>
    %60 = arith.negf %59 : vector<8x128xf32>
    %61 = math.exp %60 : vector<8x128xf32>
    %cst_19 = arith.constant 1.000000e+00 : f32
    %62 = vector.broadcast %cst_19 : f32 to vector<8x128xf32>
    %63 = arith.addf %62, %61 : vector<8x128xf32>
    %64 = arith.divf %62, %63 : vector<8x128xf32>
    %65 = arith.mulf %56, %33 : vector<8x128xf32>
    %66 = arith.mulf %50, %58 : vector<8x128xf32>
    %67 = arith.addf %65, %66 : vector<8x128xf32>
    %68 = math.tanh %67 : vector<8x128xf32>
    %69 = arith.mulf %64, %68 : vector<8x128xf32>
    %70 = arith.index_cast %c1_i32 : i32 to index
    %c0_20 = arith.constant 0 : index
    %c0_21 = arith.constant 0 : index
    %71 = vector.load %arg3[%70, %c0_20, %c0_21] : memref<8x8x128xf32, #tpu.memory_space<vmem>>, vector<1x8x128xf32>
    %72 = vector.shape_cast %71 : vector<1x8x128xf32> to vector<8x128xf32>
    %73 = vector.shape_cast %69 : vector<8x128xf32> to vector<1x8x128xf32>
    tpu.vector_store %arg3[%70, %c0_20, %c0_21], %73 {strides = array<i32>} : memref<8x8x128xf32, #tpu.memory_space<vmem>>, vector<1x8x128xf32>,
    %c2_i32 = arith.constant 2 : i32
    %74 = arith.index_cast %c2_i32 : i32 to index
    %c0_22 = arith.constant 0 : index
    %c0_23 = arith.constant 0 : index
    %75 = vector.load %arg1[%74, %c0_22, %c0_23] : memref<8x8x512xf32, #tpu.memory_space<vmem>>, vector<1x8x512xf32>
    %76 = vector.shape_cast %75 : vector<1x8x512xf32> to vector<8x512xf32>
    %cst_24 = arith.constant dense<0.000000e+00> : vector<8x512xf32>
    %77 = tpu.matmul %69, %3, %cst_24 {dimension_numbers = #tpu.dot_dimension_numbers<[1], [0], [0], [1], [0, 0, 1, 1], [], []>} : vector<8x128xf32>, vector<128x512xf32>, vector<8x512xf32> -> vector<8x512xf32>
    %78 = arith.addf %76, %77 : vector<8x512xf32>
    %79 = vector.extract_strided_slice %78 {offsets = [0, 0], sizes = [8, 128], strides = [1, 1]} : vector<8x512xf32> to vector<8x128xf32>
    %80 = arith.negf %79 : vector<8x128xf32>
    %81 = math.exp %80 : vector<8x128xf32>
    %cst_25 = arith.constant 1.000000e+00 : f32
    %82 = vector.broadcast %cst_25 : f32 to vector<8x128xf32>
    %83 = arith.addf %82, %81 : vector<8x128xf32>
    %84 = arith.divf %82, %83 : vector<8x128xf32>
    %85 = vector.extract_strided_slice %78 {offsets = [0, 128], sizes = [8, 128], strides = [1, 1]} : vector<8x512xf32> to vector<8x128xf32>
    %86 = arith.negf %85 : vector<8x128xf32>
    %87 = math.exp %86 : vector<8x128xf32>
    %cst_26 = arith.constant 1.000000e+00 : f32
    %88 = vector.broadcast %cst_26 : f32 to vector<8x128xf32>
    %89 = arith.addf %88, %87 : vector<8x128xf32>
    %90 = arith.divf %88, %89 : vector<8x128xf32>
    %91 = vector.extract_strided_slice %78 {offsets = [0, 256], sizes = [8, 128], strides = [1, 1]} : vector<8x512xf32> to vector<8x128xf32>
    %92 = math.tanh %91 : vector<8x128xf32>
    %93 = vector.extract_strided_slice %78 {offsets = [0, 384], sizes = [8, 128], strides = [1, 1]} : vector<8x512xf32> to vector<8x128xf32>
    %94 = arith.negf %93 : vector<8x128xf32>
    %95 = math.exp %94 : vector<8x128xf32>
    %cst_27 = arith.constant 1.000000e+00 : f32
    %96 = vector.broadcast %cst_27 : f32 to vector<8x128xf32>
    %97 = arith.addf %96, %95 : vector<8x128xf32>
    %98 = arith.divf %96, %97 : vector<8x128xf32>
    %99 = arith.mulf %90, %67 : vector<8x128xf32>
    %100 = arith.mulf %84, %92 : vector<8x128xf32>
    %101 = arith.addf %99, %100 : vector<8x128xf32>
    %102 = math.tanh %101 : vector<8x128xf32>
    %103 = arith.mulf %98, %102 : vector<8x128xf32>
    %104 = arith.index_cast %c2_i32 : i32 to index
    %c0_28 = arith.constant 0 : index
    %c0_29 = arith.constant 0 : index
    %105 = vector.load %arg3[%104, %c0_28, %c0_29] : memref<8x8x128xf32, #tpu.memory_space<vmem>>, vector<1x8x128xf32>
    %106 = vector.shape_cast %105 : vector<1x8x128xf32> to vector<8x128xf32>
    %107 = vector.shape_cast %103 : vector<8x128xf32> to vector<1x8x128xf32>
    tpu.vector_store %arg3[%104, %c0_28, %c0_29], %107 {strides = array<i32>} : memref<8x8x128xf32, #tpu.memory_space<vmem>>, vector<1x8x128xf32>,
    %c3_i32 = arith.constant 3 : i32
    %108 = arith.index_cast %c3_i32 : i32 to index
    %c0_30 = arith.constant 0 : index
    %c0_31 = arith.constant 0 : index
    %109 = vector.load %arg1[%108, %c0_30, %c0_31] : memref<8x8x512xf32, #tpu.memory_space<vmem>>, vector<1x8x512xf32>
    %110 = vector.shape_cast %109 : vector<1x8x512xf32> to vector<8x512xf32>
    %cst_32 = arith.constant dense<0.000000e+00> : vector<8x512xf32>
    %111 = tpu.matmul %103, %3, %cst_32 {dimension_numbers = #tpu.dot_dimension_numbers<[1], [0], [0], [1], [0, 0, 1, 1], [], []>} : vector<8x128xf32>, vector<128x512xf32>, vector<8x512xf32> -> vector<8x512xf32>
    %112 = arith.addf %110, %111 : vector<8x512xf32>
    %113 = vector.extract_strided_slice %112 {offsets = [0, 0], sizes = [8, 128], strides = [1, 1]} : vector<8x512xf32> to vector<8x128xf32>
    %114 = arith.negf %113 : vector<8x128xf32>
    %115 = math.exp %114 : vector<8x128xf32>
    %cst_33 = arith.constant 1.000000e+00 : f32
    %116 = vector.broadcast %cst_33 : f32 to vector<8x128xf32>
    %117 = arith.addf %116, %115 : vector<8x128xf32>
    %118 = arith.divf %116, %117 : vector<8x128xf32>
    %119 = vector.extract_strided_slice %112 {offsets = [0, 128], sizes = [8, 128], strides = [1, 1]} : vector<8x512xf32> to vector<8x128xf32>
    %120 = arith.negf %119 : vector<8x128xf32>
    %121 = math.exp %120 : vector<8x128xf32>
    %cst_34 = arith.constant 1.000000e+00 : f32
    %122 = vector.broadcast %cst_34 : f32 to vector<8x128xf32>
    %123 = arith.addf %122, %121 : vector<8x128xf32>
    %124 = arith.divf %122, %123 : vector<8x128xf32>
    %125 = vector.extract_strided_slice %112 {offsets = [0, 256], sizes = [8, 128], strides = [1, 1]} : vector<8x512xf32> to vector<8x128xf32>
    %126 = math.tanh %125 : vector<8x128xf32>
    %127 = vector.extract_strided_slice %112 {offsets = [0, 384], sizes = [8, 128], strides = [1, 1]} : vector<8x512xf32> to vector<8x128xf32>
    %128 = arith.negf %127 : vector<8x128xf32>
    %129 = math.exp %128 : vector<8x128xf32>
    %cst_35 = arith.constant 1.000000e+00 : f32
    %130 = vector.broadcast %cst_35 : f32 to vector<8x128xf32>
    %131 = arith.addf %130, %129 : vector<8x128xf32>
    %132 = arith.divf %130, %131 : vector<8x128xf32>
    %133 = arith.mulf %124, %101 : vector<8x128xf32>
    %134 = arith.mulf %118, %126 : vector<8x128xf32>
    %135 = arith.addf %133, %134 : vector<8x128xf32>
    %136 = math.tanh %135 : vector<8x128xf32>
    %137 = arith.mulf %132, %136 : vector<8x128xf32>
    %138 = arith.index_cast %c3_i32 : i32 to index
    %c0_36 = arith.constant 0 : index
    %c0_37 = arith.constant 0 : index
    %139 = vector.load %arg3[%138, %c0_36, %c0_37] : memref<8x8x128xf32, #tpu.memory_space<vmem>>, vector<1x8x128xf32>
    %140 = vector.shape_cast %139 : vector<1x8x128xf32> to vector<8x128xf32>
    %141 = vector.shape_cast %137 : vector<8x128xf32> to vector<1x8x128xf32>
    tpu.vector_store %arg3[%138, %c0_36, %c0_37], %141 {strides = array<i32>} : memref<8x8x128xf32, #tpu.memory_space<vmem>>, vector<1x8x128xf32>,
    %c4_i32 = arith.constant 4 : i32
    %142 = arith.index_cast %c4_i32 : i32 to index
    %c0_38 = arith.constant 0 : index
    %c0_39 = arith.constant 0 : index
    %143 = vector.load %arg1[%142, %c0_38, %c0_39] : memref<8x8x512xf32, #tpu.memory_space<vmem>>, vector<1x8x512xf32>
    %144 = vector.shape_cast %143 : vector<1x8x512xf32> to vector<8x512xf32>
    %cst_40 = arith.constant dense<0.000000e+00> : vector<8x512xf32>
    %145 = tpu.matmul %137, %3, %cst_40 {dimension_numbers = #tpu.dot_dimension_numbers<[1], [0], [0], [1], [0, 0, 1, 1], [], []>} : vector<8x128xf32>, vector<128x512xf32>, vector<8x512xf32> -> vector<8x512xf32>
    %146 = arith.addf %144, %145 : vector<8x512xf32>
    %147 = vector.extract_strided_slice %146 {offsets = [0, 0], sizes = [8, 128], strides = [1, 1]} : vector<8x512xf32> to vector<8x128xf32>
    %148 = arith.negf %147 : vector<8x128xf32>
    %149 = math.exp %148 : vector<8x128xf32>
    %cst_41 = arith.constant 1.000000e+00 : f32
    %150 = vector.broadcast %cst_41 : f32 to vector<8x128xf32>
    %151 = arith.addf %150, %149 : vector<8x128xf32>
    %152 = arith.divf %150, %151 : vector<8x128xf32>
    %153 = vector.extract_strided_slice %146 {offsets = [0, 128], sizes = [8, 128], strides = [1, 1]} : vector<8x512xf32> to vector<8x128xf32>
    %154 = arith.negf %153 : vector<8x128xf32>
    %155 = math.exp %154 : vector<8x128xf32>
    %cst_42 = arith.constant 1.000000e+00 : f32
    %156 = vector.broadcast %cst_42 : f32 to vector<8x128xf32>
    %157 = arith.addf %156, %155 : vector<8x128xf32>
    %158 = arith.divf %156, %157 : vector<8x128xf32>
    %159 = vector.extract_strided_slice %146 {offsets = [0, 256], sizes = [8, 128], strides = [1, 1]} : vector<8x512xf32> to vector<8x128xf32>
    %160 = math.tanh %159 : vector<8x128xf32>
    %161 = vector.extract_strided_slice %146 {offsets = [0, 384], sizes = [8, 128], strides = [1, 1]} : vector<8x512xf32> to vector<8x128xf32>
    %162 = arith.negf %161 : vector<8x128xf32>
    %163 = math.exp %162 : vector<8x128xf32>
    %cst_43 = arith.constant 1.000000e+00 : f32
    %164 = vector.broadcast %cst_43 : f32 to vector<8x128xf32>
    %165 = arith.addf %164, %163 : vector<8x128xf32>
    %166 = arith.divf %164, %165 : vector<8x128xf32>
    %167 = arith.mulf %158, %135 : vector<8x128xf32>
    %168 = arith.mulf %152, %160 : vector<8x128xf32>
    %169 = arith.addf %167, %168 : vector<8x128xf32>
    %170 = math.tanh %169 : vector<8x128xf32>
    %171 = arith.mulf %166, %170 : vector<8x128xf32>
    %172 = arith.index_cast %c4_i32 : i32 to index
    %c0_44 = arith.constant 0 : index
    %c0_45 = arith.constant 0 : index
    %173 = vector.load %arg3[%172, %c0_44, %c0_45] : memref<8x8x128xf32, #tpu.memory_space<vmem>>, vector<1x8x128xf32>
    %174 = vector.shape_cast %173 : vector<1x8x128xf32> to vector<8x128xf32>
    %175 = vector.shape_cast %171 : vector<8x128xf32> to vector<1x8x128xf32>
    tpu.vector_store %arg3[%172, %c0_44, %c0_45], %175 {strides = array<i32>} : memref<8x8x128xf32, #tpu.memory_space<vmem>>, vector<1x8x128xf32>,
    %c5_i32 = arith.constant 5 : i32
    %176 = arith.index_cast %c5_i32 : i32 to index
    %c0_46 = arith.constant 0 : index
    %c0_47 = arith.constant 0 : index
    %177 = vector.load %arg1[%176, %c0_46, %c0_47] : memref<8x8x512xf32, #tpu.memory_space<vmem>>, vector<1x8x512xf32>
    %178 = vector.shape_cast %177 : vector<1x8x512xf32> to vector<8x512xf32>
    %cst_48 = arith.constant dense<0.000000e+00> : vector<8x512xf32>
    %179 = tpu.matmul %171, %3, %cst_48 {dimension_numbers = #tpu.dot_dimension_numbers<[1], [0], [0], [1], [0, 0, 1, 1], [], []>} : vector<8x128xf32>, vector<128x512xf32>, vector<8x512xf32> -> vector<8x512xf32>
    %180 = arith.addf %178, %179 : vector<8x512xf32>
    %181 = vector.extract_strided_slice %180 {offsets = [0, 0], sizes = [8, 128], strides = [1, 1]} : vector<8x512xf32> to vector<8x128xf32>
    %182 = arith.negf %181 : vector<8x128xf32>
    %183 = math.exp %182 : vector<8x128xf32>
    %cst_49 = arith.constant 1.000000e+00 : f32
    %184 = vector.broadcast %cst_49 : f32 to vector<8x128xf32>
    %185 = arith.addf %184, %183 : vector<8x128xf32>
    %186 = arith.divf %184, %185 : vector<8x128xf32>
    %187 = vector.extract_strided_slice %180 {offsets = [0, 128], sizes = [8, 128], strides = [1, 1]} : vector<8x512xf32> to vector<8x128xf32>
    %188 = arith.negf %187 : vector<8x128xf32>
    %189 = math.exp %188 : vector<8x128xf32>
    %cst_50 = arith.constant 1.000000e+00 : f32
    %190 = vector.broadcast %cst_50 : f32 to vector<8x128xf32>
    %191 = arith.addf %190, %189 : vector<8x128xf32>
    %192 = arith.divf %190, %191 : vector<8x128xf32>
    %193 = vector.extract_strided_slice %180 {offsets = [0, 256], sizes = [8, 128], strides = [1, 1]} : vector<8x512xf32> to vector<8x128xf32>
    %194 = math.tanh %193 : vector<8x128xf32>
    %195 = vector.extract_strided_slice %180 {offsets = [0, 384], sizes = [8, 128], strides = [1, 1]} : vector<8x512xf32> to vector<8x128xf32>
    %196 = arith.negf %195 : vector<8x128xf32>
    %197 = math.exp %196 : vector<8x128xf32>
    %cst_51 = arith.constant 1.000000e+00 : f32
    %198 = vector.broadcast %cst_51 : f32 to vector<8x128xf32>
    %199 = arith.addf %198, %197 : vector<8x128xf32>
    %200 = arith.divf %198, %199 : vector<8x128xf32>
    %201 = arith.mulf %192, %169 : vector<8x128xf32>
    %202 = arith.mulf %186, %194 : vector<8x128xf32>
    %203 = arith.addf %201, %202 : vector<8x128xf32>
    %204 = math.tanh %203 : vector<8x128xf32>
    %205 = arith.mulf %200, %204 : vector<8x128xf32>
    %206 = arith.index_cast %c5_i32 : i32 to index
    %c0_52 = arith.constant 0 : index
    %c0_53 = arith.constant 0 : index
    %207 = vector.load %arg3[%206, %c0_52, %c0_53] : memref<8x8x128xf32, #tpu.memory_space<vmem>>, vector<1x8x128xf32>
    %208 = vector.shape_cast %207 : vector<1x8x128xf32> to vector<8x128xf32>
    %209 = vector.shape_cast %205 : vector<8x128xf32> to vector<1x8x128xf32>
    tpu.vector_store %arg3[%206, %c0_52, %c0_53], %209 {strides = array<i32>} : memref<8x8x128xf32, #tpu.memory_space<vmem>>, vector<1x8x128xf32>,
    %c6_i32 = arith.constant 6 : i32
    %210 = arith.index_cast %c6_i32 : i32 to index
    %c0_54 = arith.constant 0 : index
    %c0_55 = arith.constant 0 : index
    %211 = vector.load %arg1[%210, %c0_54, %c0_55] : memref<8x8x512xf32, #tpu.memory_space<vmem>>, vector<1x8x512xf32>
    %212 = vector.shape_cast %211 : vector<1x8x512xf32> to vector<8x512xf32>
    %cst_56 = arith.constant dense<0.000000e+00> : vector<8x512xf32>
    %213 = tpu.matmul %205, %3, %cst_56 {dimension_numbers = #tpu.dot_dimension_numbers<[1], [0], [0], [1], [0, 0, 1, 1], [], []>} : vector<8x128xf32>, vector<128x512xf32>, vector<8x512xf32> -> vector<8x512xf32>
    %214 = arith.addf %212, %213 : vector<8x512xf32>
    %215 = vector.extract_strided_slice %214 {offsets = [0, 0], sizes = [8, 128], strides = [1, 1]} : vector<8x512xf32> to vector<8x128xf32>
    %216 = arith.negf %215 : vector<8x128xf32>
    %217 = math.exp %216 : vector<8x128xf32>
    %cst_57 = arith.constant 1.000000e+00 : f32
    %218 = vector.broadcast %cst_57 : f32 to vector<8x128xf32>
    %219 = arith.addf %218, %217 : vector<8x128xf32>
    %220 = arith.divf %218, %219 : vector<8x128xf32>
    %221 = vector.extract_strided_slice %214 {offsets = [0, 128], sizes = [8, 128], strides = [1, 1]} : vector<8x512xf32> to vector<8x128xf32>
    %222 = arith.negf %221 : vector<8x128xf32>
    %223 = math.exp %222 : vector<8x128xf32>
    %cst_58 = arith.constant 1.000000e+00 : f32
    %224 = vector.broadcast %cst_58 : f32 to vector<8x128xf32>
    %225 = arith.addf %224, %223 : vector<8x128xf32>
    %226 = arith.divf %224, %225 : vector<8x128xf32>
    %227 = vector.extract_strided_slice %214 {offsets = [0, 256], sizes = [8, 128], strides = [1, 1]} : vector<8x512xf32> to vector<8x128xf32>
    %228 = math.tanh %227 : vector<8x128xf32>
    %229 = vector.extract_strided_slice %214 {offsets = [0, 384], sizes = [8, 128], strides = [1, 1]} : vector<8x512xf32> to vector<8x128xf32>
    %230 = arith.negf %229 : vector<8x128xf32>
    %231 = math.exp %230 : vector<8x128xf32>
    %cst_59 = arith.constant 1.000000e+00 : f32
    %232 = vector.broadcast %cst_59 : f32 to vector<8x128xf32>
    %233 = arith.addf %232, %231 : vector<8x128xf32>
    %234 = arith.divf %232, %233 : vector<8x128xf32>
    %235 = arith.mulf %226, %203 : vector<8x128xf32>
    %236 = arith.mulf %220, %228 : vector<8x128xf32>
    %237 = arith.addf %235, %236 : vector<8x128xf32>
    %238 = math.tanh %237 : vector<8x128xf32>
    %239 = arith.mulf %234, %238 : vector<8x128xf32>
    %240 = arith.index_cast %c6_i32 : i32 to index
    %c0_60 = arith.constant 0 : index
    %c0_61 = arith.constant 0 : index
    %241 = vector.load %arg3[%240, %c0_60, %c0_61] : memref<8x8x128xf32, #tpu.memory_space<vmem>>, vector<1x8x128xf32>
    %242 = vector.shape_cast %241 : vector<1x8x128xf32> to vector<8x128xf32>
    %243 = vector.shape_cast %239 : vector<8x128xf32> to vector<1x8x128xf32>
    tpu.vector_store %arg3[%240, %c0_60, %c0_61], %243 {strides = array<i32>} : memref<8x8x128xf32, #tpu.memory_space<vmem>>, vector<1x8x128xf32>,
    %c7_i32 = arith.constant 7 : i32
    %244 = arith.index_cast %c7_i32 : i32 to index
    %c0_62 = arith.constant 0 : index
    %c0_63 = arith.constant 0 : index
    %245 = vector.load %arg1[%244, %c0_62, %c0_63] : memref<8x8x512xf32, #tpu.memory_space<vmem>>, vector<1x8x512xf32>
    %246 = vector.shape_cast %245 : vector<1x8x512xf32> to vector<8x512xf32>
    %cst_64 = arith.constant dense<0.000000e+00> : vector<8x512xf32>
    %247 = tpu.matmul %239, %3, %cst_64 {dimension_numbers = #tpu.dot_dimension_numbers<[1], [0], [0], [1], [0, 0, 1, 1], [], []>} : vector<8x128xf32>, vector<128x512xf32>, vector<8x512xf32> -> vector<8x512xf32>
    %248 = arith.addf %246, %247 : vector<8x512xf32>
    %249 = vector.extract_strided_slice %248 {offsets = [0, 0], sizes = [8, 128], strides = [1, 1]} : vector<8x512xf32> to vector<8x128xf32>
    %250 = arith.negf %249 : vector<8x128xf32>
    %251 = math.exp %250 : vector<8x128xf32>
    %cst_65 = arith.constant 1.000000e+00 : f32
    %252 = vector.broadcast %cst_65 : f32 to vector<8x128xf32>
    %253 = arith.addf %252, %251 : vector<8x128xf32>
    %254 = arith.divf %252, %253 : vector<8x128xf32>
    %255 = vector.extract_strided_slice %248 {offsets = [0, 128], sizes = [8, 128], strides = [1, 1]} : vector<8x512xf32> to vector<8x128xf32>
    %256 = arith.negf %255 : vector<8x128xf32>
    %257 = math.exp %256 : vector<8x128xf32>
    %cst_66 = arith.constant 1.000000e+00 : f32
    %258 = vector.broadcast %cst_66 : f32 to vector<8x128xf32>
    %259 = arith.addf %258, %257 : vector<8x128xf32>
    %260 = arith.divf %258, %259 : vector<8x128xf32>
    %261 = vector.extract_strided_slice %248 {offsets = [0, 256], sizes = [8, 128], strides = [1, 1]} : vector<8x512xf32> to vector<8x128xf32>
    %262 = math.tanh %261 : vector<8x128xf32>
    %263 = vector.extract_strided_slice %248 {offsets = [0, 384], sizes = [8, 128], strides = [1, 1]} : vector<8x512xf32> to vector<8x128xf32>
    %264 = arith.negf %263 : vector<8x128xf32>
    %265 = math.exp %264 : vector<8x128xf32>
    %cst_67 = arith.constant 1.000000e+00 : f32
    %266 = vector.broadcast %cst_67 : f32 to vector<8x128xf32>
    %267 = arith.addf %266, %265 : vector<8x128xf32>
    %268 = arith.divf %266, %267 : vector<8x128xf32>
    %269 = arith.mulf %260, %237 : vector<8x128xf32>
    %270 = arith.mulf %254, %262 : vector<8x128xf32>
    %271 = arith.addf %269, %270 : vector<8x128xf32>
    %272 = math.tanh %271 : vector<8x128xf32>
    %273 = arith.mulf %268, %272 : vector<8x128xf32>
    %274 = arith.index_cast %c7_i32 : i32 to index
    %c0_68 = arith.constant 0 : index
    %c0_69 = arith.constant 0 : index
    %275 = vector.load %arg3[%274, %c0_68, %c0_69] : memref<8x8x128xf32, #tpu.memory_space<vmem>>, vector<1x8x128xf32>
    %276 = vector.shape_cast %275 : vector<1x8x128xf32> to vector<8x128xf32>
    %277 = vector.shape_cast %273 : vector<8x128xf32> to vector<1x8x128xf32>
    tpu.vector_store %arg3[%274, %c0_68, %c0_69], %277 {strides = array<i32>} : memref<8x8x128xf32, #tpu.memory_space<vmem>>, vector<1x8x128xf32>,
    %c8_i32 = arith.constant 8 : i32
    %c0_70 = arith.constant 0 : index
    %c0_71 = arith.constant 0 : index
    %278 = vector.load %arg6[%c0_70, %c0_71] : memref<8x128xf32, #tpu.memory_space<vmem>>, vector<8x128xf32>
    tpu.vector_store %arg6[%c0_70, %c0_71], %273 {strides = array<i32>} : memref<8x128xf32, #tpu.memory_space<vmem>>, vector<8x128xf32>,
    %c0_72 = arith.constant 0 : index
    %c0_73 = arith.constant 0 : index
    %279 = vector.load %arg7[%c0_72, %c0_73] : memref<8x128xf32, #tpu.memory_space<vmem>>, vector<8x128xf32>
    tpu.vector_store %arg7[%c0_72, %c0_73], %271 {strides = array<i32>} : memref<8x128xf32, #tpu.memory_space<vmem>>, vector<8x128xf32>,
    %c0_i32_74 = arith.constant 0 : i32
    %280 = arith.cmpi eq, %arg0, %c0_i32_74 : i32
    %281 = arith.extui %280 : i1 to i32
    %c0_i32_75 = arith.constant 0 : i32
    %282 = arith.cmpi ne, %281, %c0_i32_75 : i32
    scf.if %282 {
      %c0_76 = arith.constant 0 : index
      %c0_77 = arith.constant 0 : index
      %283 = vector.load %arg4[%c0_76, %c0_77] : memref<8x128xf32, #tpu.memory_space<vmem>>, vector<8x128xf32>
      tpu.vector_store %arg4[%c0_76, %c0_77], %273 {strides = array<i32>} : memref<8x128xf32, #tpu.memory_space<vmem>>, vector<8x128xf32>,
      %c0_78 = arith.constant 0 : index
      %c0_79 = arith.constant 0 : index
      %284 = vector.load %arg5[%c0_78, %c0_79] : memref<8x128xf32, #tpu.memory_space<vmem>>, vector<8x128xf32>
      tpu.vector_store %arg5[%c0_78, %c0_79], %271 {strides = array<i32>} : memref<8x128xf32, #tpu.memory_space<vmem>>, vector<8x128xf32>,
    } else {
    }
    return
  }
  func.func @transform_0(%arg0: i32) -> (i32, i32, i32) {
    %c0_i32 = arith.constant 0 : i32
    %c0_i32_0 = arith.constant 0 : i32
    %c0_i32_1 = arith.constant 0 : i32
    return %arg0, %c0_i32, %c0_i32_0 : i32, i32, i32
  }
  func.func @transform_1(%arg0: i32) -> (i32, i32) {
    %c0_i32 = arith.constant 0 : i32
    %c0_i32_0 = arith.constant 0 : i32
    %c0_i32_1 = arith.constant 0 : i32
    return %c0_i32, %c0_i32_0 : i32, i32
  }
  func.func @transform_2(%arg0: i32) -> (i32, i32, i32) {
    %c0_i32 = arith.constant 0 : i32
    %c0_i32_0 = arith.constant 0 : i32
    %c0_i32_1 = arith.constant 0 : i32
    return %arg0, %c0_i32, %c0_i32_0 : i32, i32, i32
  }
  func.func @transform_3(%arg0: i32) -> (i32, i32) {
    %c0_i32 = arith.constant 0 : i32
    %c0_i32_0 = arith.constant 0 : i32
    %c0_i32_1 = arith.constant 0 : i32
    return %c0_i32, %c0_i32_0 : i32, i32
  }
  func.func @transform_4(%arg0: i32) -> (i32, i32) {
    %c0_i32 = arith.constant 0 : i32
    %c0_i32_0 = arith.constant 0 : i32
    %c0_i32_1 = arith.constant 0 : i32
    return %c0_i32, %c0_i32_0 : i32, i32
  }
}

</mosaic_0001>

<bundles_post_ra>
// kernel: tpu_custom_call.1
= control target key start
LH: loop header
LB: loop body
LE: loop exit
PB: predicated region body
PF: predicated region fallthrough
CT: control target
= control target key end

     0   :  { %10 = vsyncpa [#allocation5], 0  ;;  %s2845_s0 = inlined_call_operand.hbm [shape: f32[8,8,512], index: 0, kind: input, shape index: {}]   ;;  %s2846_s1 = inlined_call_operand.hbm [shape: f32[128,512], index: 1, kind: input, shape index: {}]   ;;  %s2847_s2 = inlined_call_operand.hbm [shape: f32[8,8,128], index: 2, kind: output, shape index: {0}]   ;;  %s2848_s3 = inlined_call_operand.hbm [shape: f32[8,128], index: 3, kind: output, shape index: {1}]   ;;  %s2849_s4 = inlined_call_operand.hbm [shape: f32[8,128], index: 4, kind: output, shape index: {2}]  }
   0x1   :  { %11 = vsyncpa [#allocation8], 0 }
   0x2   :  { %12 = vsyncpa [#allocation6], 0 }
   0x3   :  { %13 = vsyncpa [#allocation11], 0  ;;  %s2374_s15 = smov [#allocation4]   ;;  %s2256_s19 = scalar_lea.hbm %s2845_s0, 4096 }
   0x4   :  { %s19_s16 = sshll.u32 %s2374_s15, 4  ;;  %p2257_p0 = scmp.ne.s32.totalorder %s2845_s0, %s2256_s19  ;;  %s20_s16 = int_to_ptr.vmem [resolvable:$true] %s19_s16 }
   0x5   :  { %p2260_p1 = scmp.lt.u32.totalorder %s2256_s19, %s2845_s0 }
   0x7   :  { %p2262_p2 = pnand %p2260_p1, %p2257_p0 }
   0x9   :  { %2265 = shalt.err (!%p2262_p2)
}
   0xa   :  { %s2266_s24 = scalar_lea.vmem %s20_s16, 4096  ;;  %p2271_p4 = scmp.lt.s32.totalorder %s20_s16, %s20_s16 }
   0xb   :  { %p2267_p3 = scmp.ne.s32.totalorder %s20_s16, %s2266_s24  ;;  %p2272_p5 = scmp.lt.s32.totalorder %s2266_s24, %s2266_s24 }
   0xd   :  { %p2273_p6 = por %p2272_p5, %p2271_p4 }
   0xf   :  { %p2274_p7 = pnand %p2273_p6, %p2267_p3 }
  0x11   :  { %2277 = shalt.err (!%p2274_p7)
}
  0x12   :  { %s2375_s25 = smov 512   ;;  %s2376_s26 = smov 32  }
  0x13   :  { %25 = dma.hbm_to_vmem [thread:$0]  %s2845_s0, 4096, %s20_s16, [#allocation5], %s2375_s25, %s2375_s25, %s2376_s26  }
  0x14   :  { %s2377_s29 = smov [#allocation7]   ;;  %s2278_s7 = scalar_lea.hbm %s2846_s1, 8192 }
  0x15   :  { %s31_s30 = sshll.u32 %s2377_s29, 4  ;;  %p2279_p8 = scmp.ne.s32.totalorder %s2846_s1, %s2278_s7  ;;  %s32_s30 = int_to_ptr.vmem [resolvable:$true] %s31_s30 }
  0x16   :  { %p2282_p9 = scmp.lt.u32.totalorder %s2278_s7, %s2846_s1 }
  0x18   :  { %p2284_p10 = pnand %p2282_p9, %p2279_p8 }
  0x1a   :  { %2287 = shalt.err (!%p2284_p10)
}
  0x1b   :  { %s2288_s12 = scalar_lea.vmem %s32_s30, 8192  ;;  %p2293_p12 = scmp.lt.s32.totalorder %s32_s30, %s32_s30 }
  0x1c   :  { %p2289_p11 = scmp.ne.s32.totalorder %s32_s30, %s2288_s12  ;;  %p2294_p13 = scmp.lt.s32.totalorder %s2288_s12, %s2288_s12 }
  0x1e   :  { %p2295_p0 = por %p2294_p13, %p2293_p12 }
  0x20   :  { %p2296_p1 = pnand %p2295_p0, %p2289_p11 }
  0x22   :  { %2299 = shalt.err (!%p2296_p1)
}
  0x23   :  { %37 = dma.hbm_to_vmem [thread:$0]  %s2846_s1, 8192, %s32_s30, [#allocation8], %s2375_s25, %s2375_s25, %s2376_s26  }
  0x24   :  { %2366 = dma.done.wait [#allocation5], 4096  }
  0x25   :  { %2367 = vsyncadd [#allocation5], 4294963200 }
  0x26   :  { %2368 = dma.done.wait [#allocation8], 8192  }
  0x27   :  { %2369 = vsyncadd [#allocation8], 4294959104  ;;  %v2378_v0 = vmov 0.0   ;;  %v51_v1 = vld [vmem:[#allocation7 + $0x8] sm:$0xff]  ;;  %v50_v3 = vld [vmem:[#allocation7] sm:$0xff]  ;;  %s2379_s1 = smov [#allocation10]  }
  0x28   :  { %184 = vmatprep.mubr.f32.mxu0 %v2378_v0  ;;  %255 = vmatprep.mubr.f32.mxu1 %v2378_v0  ;;  %v55_v2 = vld [vmem:[#allocation7 + $0x28] sm:$0xff]  ;;  %v54_v5 = vld [vmem:[#allocation7 + $0x20] sm:$0xff]  ;;  %v53_v19 = vld [vmem:[#allocation7 + $0x18] sm:$0xff]  ;;  %s1555_s14 = sshll.u32 %s2379_s1, 4  ;;  %s2380_s15 = smov [#allocation9]   ;;  %s1556_s14 = int_to_ptr.vmem [resolvable:$true] %s1555_s14 }
  0x29   :  { %v2435_v4 = vpack.c.bf16 %v55_v2, %v51_v1  ;;  %v59_v6 = vld [vmem:[#allocation7 + $0x48] sm:$0xff]  ;;  %v2437_v8 = vpack.c.bf16 %v54_v5, %v50_v3  ;;  %v58_v10 = vld [vmem:[#allocation7 + $0x40] sm:$0xff]  ;;  %v57_v20 = vld [vmem:[#allocation7 + $0x38] sm:$0xff]  ;;  %s1542_s16 = sshll.u32 %s2380_s15, 4  ;;  %s2381_s17 = smov [#allocation12]   ;;  %s2795_s16 = int_to_ptr.vmem [resolvable:$true] %s1542_s16 }
  0x2a   :  { %v63_v7 = vld [vmem:[#allocation7 + $0x68] sm:$0xff]  ;;  %v62_v11 = vld [vmem:[#allocation7 + $0x60] sm:$0xff]  ;;  %v2448_v22 = vpack.c.bf16 %v57_v20, %v53_v19  ;;  %v52_v23 = vld [vmem:[#allocation7 + $0x10] sm:$0xff]  ;;  %s1565_s18 = sshll.u32 %s2381_s17, 4  ;;  %s2300_s19 = scalar_lea.vmem %s1556_s14, 128  ;;  %s2797_s18 = int_to_ptr.vmem [resolvable:$true] %s1565_s18 }
  0x2b   :  { %v2439_v9 = vpack.c.bf16 %v63_v7, %v59_v6  ;;  %v67_v12 = vld [vmem:[#allocation7 + $0x88] sm:$0xff]  ;;  %1607 = vmatprep.subr.bf16.mxu0 %v2435_v4  ;;  %v2443_v14 = vpack.c.bf16 %v62_v11, %v58_v10  ;;  %v66_v15 = vld [vmem:[#allocation7 + $0x80] sm:$0xff]  ;;  %v56_v24 = vld [vmem:[#allocation7 + $0x30] sm:$0xff]  ;;  %p2301_p2 = scmp.ne.s32.totalorder %s1556_s14, %s2300_s19  ;;  %p2305_p3 = scmp.lt.s32.totalorder %s1556_s14, %s1556_s14 }
  0x2c   :  { %v71_v13 = vld [vmem:[#allocation7 + $0xa8] sm:$0xff]  ;;  %1609 = vmatpush1.bf16.msra.mxu0 %v2437_v8  ;;  %v70_v16 = vld [vmem:[#allocation7 + $0xa0] sm:$0xff]  ;;  %v2450_v25 = vpack.c.bf16 %v56_v24, %v52_v23  ;;  %1639 = vmatprep.subr.bf16.mxu1 %v2448_v22  ;;  %v61_v27 = vld [vmem:[#allocation7 + $0x58] sm:$0xff]  ;;  %p2306_p4 = scmp.lt.s32.totalorder %s2300_s19, %s2300_s19 }
  0x2d   :  { %1611 = vmatprep.subr.bf16.mxu0 %v2439_v9  ;;  %v2446_v17 = vpack.c.bf16 %v71_v13, %v67_v12  ;;  %v75_v18 = vld [vmem:[#allocation7 + $0xc8] sm:$0xff]  ;;  %v2453_v26 = vpack.c.bf16 %v70_v16, %v66_v15  ;;  %v65_v28 = vld [vmem:[#allocation7 + $0x78] sm:$0xff]  ;;  %v60_v29 = vld [vmem:[#allocation7 + $0x50] sm:$0xff] }
  0x2e   :  { %v79_v21 = vld [vmem:[#allocation7 + $0xe8] sm:$0xff]  ;;  %v74_v31 = vld [vmem:[#allocation7 + $0xc0] sm:$0xff]  ;;  %1641 = vmatpush1.bf16.msra.mxu1 %v2450_v25  ;;  %v2460_v33 = vpack.c.bf16 %v65_v28, %v61_v27  ;;  %v64_v34 = vld [vmem:[#allocation7 + $0x70] sm:$0xff]  ;;  %p2307_p5 = por %p2306_p4, %p2305_p3 }
  0x2f   :  { %v2457_v30 = vpack.c.bf16 %v79_v21, %v75_v18  ;;  %v78_v32 = vld [vmem:[#allocation7 + $0xe0] sm:$0xff]  ;;  %v83_v35 = vld [vmem:[#allocation7 + $0x108] sm:$0xff]  ;;  %v2462_v37 = vpack.c.bf16 %v64_v34, %v60_v29  ;;  %v69_v38 = vld [vmem:[#allocation7 + $0x98] sm:$0xff] }
  0x30   :  { %1613 = vmatpush1.bf16.msra.mxu0 %v2443_v14  ;;  %v87_v36 = vld [vmem:[#allocation7 + $0x128] sm:$0xff]  ;;  %1643 = vmatprep.subr.bf16.mxu1 %v2460_v33  ;;  %v73_v39 = vld [vmem:[#allocation7 + $0xb8] sm:$0xff]  ;;  %v68_v40 = vld [vmem:[#allocation7 + $0x90] sm:$0xff]  ;;  %v2466_v42 = vpack.c.bf16 %v78_v32, %v74_v31  ;;  %p2308_p6 = pnand %p2307_p5, %p2301_p2 }
  0x31   :  { %1615 = vmatprep.subr.bf16.mxu0 %v2446_v17  ;;  %v72_v41 = vld [vmem:[#allocation7 + $0xb0] sm:$0xff]  ;;  %v82_v43 = vld [vmem:[#allocation7 + $0x100] sm:$0xff]  ;;  %v2468_v45 = vpack.c.bf16 %v73_v39, %v69_v38  ;;  %v2471_v46 = vpack.c.bf16 %v87_v36, %v83_v35  ;;  %v91_v47 = vld [vmem:[#allocation7 + $0x148] sm:$0xff] }
  0x32   :  { %v86_v44 = vld [vmem:[#allocation7 + $0x120] sm:$0xff]  ;;  %1645 = vmatpush1.bf16.msra.mxu1 %v2462_v37  ;;  %v2474_v48 = vpack.c.bf16 %v72_v41, %v68_v40  ;;  %v77_v49 = vld [vmem:[#allocation7 + $0xd8] sm:$0xff]  ;;  %v95_v51 = vld [vmem:[#allocation7 + $0x168] sm:$0xff] }
  0x33   :  { %v81_v50 = vld [vmem:[#allocation7 + $0xf8] sm:$0xff]  ;;  %1647 = vmatprep.subr.bf16.mxu1 %v2468_v45  ;;  %v76_v53 = vld [vmem:[#allocation7 + $0xd0] sm:$0xff]  ;;  %v2480_v55 = vpack.c.bf16 %v86_v44, %v82_v43  ;;  %v2483_v58 = vpack.c.bf16 %v95_v51, %v91_v47  ;;  %v90_v59 = vld [vmem:[#allocation7 + $0x140] sm:$0xff] }
  0x34   :  { %1617 = vmatpush1.bf16.msra.mxu0 %v2453_v26  ;;  %v2477_v52 = vpack.c.bf16 %v81_v50, %v77_v49  ;;  %v80_v54 = vld [vmem:[#allocation7 + $0xf0] sm:$0xff]  ;;  %v85_v56 = vld [vmem:[#allocation7 + $0x118] sm:$0xff]  ;;  %v94_v60 = vld [vmem:[#allocation7 + $0x160] sm:$0xff] }
  0x35   :  { %1619 = vmatprep.subr.bf16.mxu0 %v2457_v30  ;;  %v89_v57 = vld [vmem:[#allocation7 + $0x138] sm:$0xff]  ;;  %v99_v61 = vld [vmem:[#allocation7 + $0x188] sm:$0xff]  ;;  %v2486_v62 = vpack.c.bf16 %v80_v54, %v76_v53  ;;  %v84_v2 = vld [vmem:[#allocation7 + $0x110] sm:$0xff]  ;;  %v2492_v7 = vpack.c.bf16 %v94_v60, %v90_v59 }
  0x36   :  { %1649 = vmatpush1.bf16.msra.mxu1 %v2474_v48  ;;  %v103_v63 = vld [vmem:[#allocation7 + $0x1a8] sm:$0xff]  ;;  %v2489_v1 = vpack.c.bf16 %v89_v57, %v85_v56  ;;  %v88_v3 = vld [vmem:[#allocation7 + $0x130] sm:$0xff]  ;;  %v93_v5 = vld [vmem:[#allocation7 + $0x158] sm:$0xff] }
  0x37   :  { %1651 = vmatprep.subr.bf16.mxu1 %v2477_v52  ;;  %v97_v6 = vld [vmem:[#allocation7 + $0x178] sm:$0xff]  ;;  %v2495_v10 = vpack.c.bf16 %v103_v63, %v99_v61  ;;  %v98_v11 = vld [vmem:[#allocation7 + $0x180] sm:$0xff]  ;;  %v107_v13 = vld [vmem:[#allocation7 + $0x1c8] sm:$0xff]  ;;  %v2498_v15 = vpack.c.bf16 %v88_v3, %v84_v2 }
  0x38   :  { %1621 = vmatpush1.bf16.msra.mxu0 %v2466_v42  ;;  %v102_v12 = vld [vmem:[#allocation7 + $0x1a0] sm:$0xff]  ;;  %v111_v16 = vld [vmem:[#allocation7 + $0x1e8] sm:$0xff]  ;;  %v2501_v18 = vpack.c.bf16 %v97_v6, %v93_v5  ;;  %v92_v19 = vld [vmem:[#allocation7 + $0x150] sm:$0xff] }
  0x39   :  { %1623 = vmatprep.subr.bf16.mxu0 %v2471_v46  ;;  %v96_v20 = vld [vmem:[#allocation7 + $0x170] sm:$0xff]  ;;  %v101_v21 = vld [vmem:[#allocation7 + $0x198] sm:$0xff]  ;;  %v2504_v24 = vpack.c.bf16 %v102_v12, %v98_v11  ;;  %v2507_v27 = vpack.c.bf16 %v111_v16, %v107_v13  ;;  %v106_v28 = vld [vmem:[#allocation7 + $0x1c0] sm:$0xff] }
  0x3a   :  { %1653 = vmatpush1.bf16.msra.mxu1 %v2486_v62  ;;  %v105_v23 = vld [vmem:[#allocation7 + $0x1b8] sm:$0xff]  ;;  %v110_v29 = vld [vmem:[#allocation7 + $0x1e0] sm:$0xff]  ;;  %v2510_v31 = vpack.c.bf16 %v96_v20, %v92_v19  ;;  %v100_v34 = vld [vmem:[#allocation7 + $0x190] sm:$0xff] }
  0x3b   :  { %1655 = vmatprep.subr.bf16.mxu1 %v2489_v1  ;;  %v2513_v32 = vpack.c.bf16 %v105_v23, %v101_v21  ;;  %v104_v35 = vld [vmem:[#allocation7 + $0x1b0] sm:$0xff]  ;;  %v109_v36 = vld [vmem:[#allocation7 + $0x1d8] sm:$0xff]  ;;  %v2516_v39 = vpack.c.bf16 %v110_v29, %v106_v28  ;;  %v116_v49 = vld [vmem:[#allocation4] sm:$0xff] }
  0x3c   :  { %1625 = vmatpush1.bf16.msra.mxu0 %v2480_v55  ;;  %v113_v38 = vld [vmem:[#allocation7 + $0x1f8] sm:$0xff]  ;;  %v2520_v40 = vpack.c.bf16 %v104_v35, %v100_v34  ;;  %v108_v43 = vld [vmem:[#allocation7 + $0x1d0] sm:$0xff]  ;;  %v117_v50 = vld [vmem:[#allocation4 + $0x8] sm:$0xff] }
  0x3d   :  { %1627 = vmatprep.subr.bf16.mxu0 %v2483_v58  ;;  %v2523_v41 = vpack.c.bf16 %v113_v38, %v109_v36  ;;  %v112_v44 = vld [vmem:[#allocation7 + $0x1f0] sm:$0xff]  ;;  %v119_v60 = vld [vmem:[#allocation4 + $0x18] sm:$0xff] }
  0x3e   :  { %1657 = vmatpush1.bf16.msra.mxu1 %v2498_v15  ;;  %v2527_v47 = vpack.c.bf16 %v112_v44, %v108_v43  ;;  %v118_v3 = vld [vmem:[#allocation4 + $0x10] sm:$0xff]  ;;  %v292_v44 = vld [vmem:[#allocation4 + $0x20] sm:$0xff] }
  0x3f   :  { %1659 = vmatprep.subr.bf16.mxu1 %v2501_v18 }
  0x40   :  { %1629 = vmatpush1.bf16.msra.mxu0 %v2492_v7 }
  0x41   :  { %1631 = vmatprep.subr.bf16.mxu0 %v2495_v10 }
  0x42   :  { %1661 = vmatpush1.bf16.msra.mxu1 %v2510_v31 }
  0x43   :  { %1663 = vmatprep.subr.bf16.mxu1 %v2513_v32 }
  0x44   :  { %1633 = vmatpush1.bf16.msra.mxu0 %v2504_v24 }
  0x45   :  { %1635 = vmatprep.subr.bf16.mxu0 %v2507_v27 }
  0x46   :  { %1665 = vmatpush1.bf16.msra.mxu1 %v2520_v40 }
  0x47   :  { %1667 = vmatprep.subr.bf16.mxu1 %v2523_v41 }
  0x48   :  { %1637 = vmatpush1.bf16.msra.mxu0 %v2516_v39 }
  0x49   :  { %1671 = vmatprep.subr.bf16.mxu0 %v2435_v4 }
  0x4a   :  { %1669 = vmatpush1.bf16.msra.mxu1 %v2527_v47 }
  0x4b   :  { %185 = vmatmul.mubr.f32.vlgmr.msra.gmra.mrb[0].mxu0 %v2378_v0  ;;  %1703 = vmatprep.subr.bf16.mxu1 %v2448_v22 }
  0x4c   :  { %1673 = vmatpush1.bf16.msra.mxu0 %v2437_v8  ;;  %360 = vmatprep.mubr.f32.mxu0 %v2378_v0 }
  0x4d   :  { %1675 = vmatprep.subr.bf16.mxu0 %v2439_v9  ;;  %256 = vmatmul.mubr.f32.vlgmr.msra.gmra.mrb[0].mxu1 %v2378_v0 }
  0x4e   :  { %1705 = vmatpush1.bf16.msra.mxu1 %v2450_v25  ;;  %431 = vmatprep.mubr.f32.mxu1 %v2378_v0 }
  0x4f   :  { %1707 = vmatprep.subr.bf16.mxu1 %v2460_v33 }
  0x50   :  { %1677 = vmatpush1.bf16.msra.mxu0 %v2443_v14 }
  0x51   :  { %1679 = vmatprep.subr.bf16.mxu0 %v2446_v17 }
  0x52   :  { %1709 = vmatpush1.bf16.msra.mxu1 %v2462_v37 }
  0x53   :  { %1711 = vmatprep.subr.bf16.mxu1 %v2468_v45 }
  0x54   :  { %1681 = vmatpush1.bf16.msra.mxu0 %v2453_v26 }
  0x55   :  { %1683 = vmatprep.subr.bf16.mxu0 %v2457_v30 }
  0x56   :  { %1713 = vmatpush1.bf16.msra.mxu1 %v2474_v48 }
  0x57   :  { %1715 = vmatprep.subr.bf16.mxu1 %v2477_v52 }
  0x58   :  { %1685 = vmatpush1.bf16.msra.mxu0 %v2466_v42 }
  0x59   :  { %1687 = vmatprep.subr.bf16.mxu0 %v2471_v46 }
  0x5a   :  { %1717 = vmatpush1.bf16.msra.mxu1 %v2486_v62 }
  0x5b   :  { %1719 = vmatprep.subr.bf16.mxu1 %v2489_v1 }
  0x5c   :  { %1689 = vmatpush1.bf16.msra.mxu0 %v2480_v55 }
  0x5d   :  { %1691 = vmatprep.subr.bf16.mxu0 %v2483_v58 }
  0x5e   :  { %1721 = vmatpush1.bf16.msra.mxu1 %v2498_v15 }
  0x5f   :  { %1723 = vmatprep.subr.bf16.mxu1 %v2501_v18 }
  0x60   :  { %1693 = vmatpush1.bf16.msra.mxu0 %v2492_v7 }
  0x61   :  { %1695 = vmatprep.subr.bf16.mxu0 %v2495_v10 }
  0x62   :  { %1725 = vmatpush1.bf16.msra.mxu1 %v2510_v31 }
  0x63   :  { %1727 = vmatprep.subr.bf16.mxu1 %v2513_v32 }
  0x64   :  { %1697 = vmatpush1.bf16.msra.mxu0 %v2504_v24 }
  0x65   :  { %1699 = vmatprep.subr.bf16.mxu0 %v2507_v27 }
  0x66   :  { %1729 = vmatpush1.bf16.msra.mxu1 %v2520_v40 }
  0x67   :  { %1731 = vmatprep.subr.bf16.mxu1 %v2523_v41 }
  0x68   :  { %1701 = vmatpush1.bf16.msra.mxu0 %v2516_v39 }
  0x69   :  { %1735 = vmatprep.subr.bf16.mxu0 %v2435_v4 }
  0x6a   :  { %1733 = vmatpush1.bf16.msra.mxu1 %v2527_v47 }
  0x6b   :  { %1767 = vmatprep.subr.bf16.mxu1 %v2448_v22 }
 0x11e   :  { %v186_v51 = vpop.f32.mrb[0].mxu0 }
 0x11f   :  { %v262_v53 = vadd.f32 %v186_v51, %v116_v49  ;;  %v188_v54 = vpop.f32.mrb[1].mxu0  ;;  %v293_v49 = vld [vmem:[#allocation4 + $0x28] sm:$0xff] }
 0x120   :  { %v263_v56 = vadd.f32 %v188_v54, %v117_v50  ;;  %v257_v61 = vpop.f32.mrb[0].mxu1 }
 0x121   :  { %v1582_v57 = vmul.f32 -1.442695, %v262_v53  ;;  %v259_v63 = vpop.f32.mrb[1].mxu1  ;;  %v264_v6 = vadd.f32 %v257_v61, %v118_v3  ;;  %v295_v61 = vld [vmem:[#allocation4 + $0x38] sm:$0xff] }
 0x122   :  { %v1583_v59 = vmul.f32 -1.442695, %v263_v56  ;;  %v265_v2 = vadd.f32 %v259_v63, %v119_v60 }
 0x123   :  { %2128 = vpow2.f32 %v1582_v57 }
 0x124   :  { %2130 = vpow2.f32 %v1583_v59  ;;  %v1584_v5 = vmul.f32 -1.442695, %v265_v2  ;;  %v294_v2 = vld [vmem:[#allocation4 + $0x30] sm:$0xff] }
 0x126   :  { %2132 = vpow2.f32 %v1584_v5 }
 0x127   :  { %2134 = vtanh.f32 %v264_v6 }
 0x12d   :  { %v2129_v11 = vpop.eup %2128 }
 0x12e   :  { %v2131_v12 = vpop.eup %2130  ;;  %v269_v13 = vadd.f32 1.0, %v2129_v11 }
 0x12f   :  { %v275_v16 = vadd.f32 1.0, %v2131_v12 }
 0x130   :  { %2136 = vrcp.f32 %v269_v13  ;;  %v2133_v19 = vpop.eup %2132 }
 0x131   :  { %2138 = vrcp.f32 %v275_v16  ;;  %v2135_v20 = vpop.eup %2134  ;;  %v282_v23 = vadd.f32 1.0, %v2133_v19 }
 0x133   :  { %2140 = vrcp.f32 %v282_v23 }
 0x13a   :  { %v2137_v21 = vpop.eup %2136 }
 0x13b   :  { %v2139_v28 = vpop.eup %2138  ;;  %v286_v29 = vmul.f32 %v2137_v21, %v2135_v20 }
 0x13c   :  { %v285_v34 = vmul.f32 0.0, %v2139_v28 }
 0x13d   :  { %v2141_v36 = vpop.eup %2140 }
 0x13e   :  { %v2569_v35 = vadd.f32 %v286_v29, %v285_v34 }
 0x140   :  { %2142 = vtanh.f32 %v2569_v35 }
 0x14a   :  { %v2143_v38 = vpop.eup %2142 }
 0x14b   :  { %v289_v43 = vmul.f32 %v2143_v38, %v2141_v36 }
 0x14d   :  { %290 = vst [vmem:[#allocation9] sm:$0xff] %v289_v43  ;;  %361 = vmatmul.mubr.f32.vlgmr.msra.gmra.mrb[2].mxu0 %v289_v43  ;;  %432 = vmatmul.mubr.f32.vlgmr.msra.gmra.mrb[2].mxu1 %v289_v43 }
 0x14e   :  { %1737 = vmatpush1.bf16.msra.mxu0 %v2437_v8  ;;  %1769 = vmatpush1.bf16.msra.mxu1 %v2450_v25 }
 0x14f   :  { %1739 = vmatprep.subr.bf16.mxu0 %v2439_v9  ;;  %1771 = vmatprep.subr.bf16.mxu1 %v2460_v33 }
 0x150   :  { %537 = vmatprep.mubr.f32.mxu0 %v2378_v0  ;;  %608 = vmatprep.mubr.f32.mxu1 %v2378_v0 }
 0x152   :  { %1741 = vmatpush1.bf16.msra.mxu0 %v2443_v14  ;;  %1773 = vmatpush1.bf16.msra.mxu1 %v2462_v37 }
 0x153   :  { %1743 = vmatprep.subr.bf16.mxu0 %v2446_v17  ;;  %1775 = vmatprep.subr.bf16.mxu1 %v2468_v45 }
 0x156   :  { %1745 = vmatpush1.bf16.msra.mxu0 %v2453_v26  ;;  %1777 = vmatpush1.bf16.msra.mxu1 %v2474_v48 }
 0x157   :  { %1747 = vmatprep.subr.bf16.mxu0 %v2457_v30  ;;  %1779 = vmatprep.subr.bf16.mxu1 %v2477_v52 }
 0x15a   :  { %1749 = vmatpush1.bf16.msra.mxu0 %v2466_v42  ;;  %1781 = vmatpush1.bf16.msra.mxu1 %v2486_v62 }
 0x15b   :  { %1751 = vmatprep.subr.bf16.mxu0 %v2471_v46  ;;  %1783 = vmatprep.subr.bf16.mxu1 %v2489_v1 }
 0x15e   :  { %1753 = vmatpush1.bf16.msra.mxu0 %v2480_v55  ;;  %1785 = vmatpush1.bf16.msra.mxu1 %v2498_v15 }
 0x15f   :  { %1755 = vmatprep.subr.bf16.mxu0 %v2483_v58  ;;  %1787 = vmatprep.subr.bf16.mxu1 %v2501_v18 }
 0x162   :  { %1757 = vmatpush1.bf16.msra.mxu0 %v2492_v7  ;;  %1789 = vmatpush1.bf16.msra.mxu1 %v2510_v31 }
 0x163   :  { %1759 = vmatprep.subr.bf16.mxu0 %v2495_v10  ;;  %1791 = vmatprep.subr.bf16.mxu1 %v2513_v32 }
 0x166   :  { %1761 = vmatpush1.bf16.msra.mxu0 %v2504_v24  ;;  %1793 = vmatpush1.bf16.msra.mxu1 %v2520_v40 }
 0x167   :  { %1763 = vmatprep.subr.bf16.mxu0 %v2507_v27  ;;  %1795 = vmatprep.subr.bf16.mxu1 %v2523_v41 }
 0x16a   :  { %1765 = vmatpush1.bf16.msra.mxu0 %v2516_v39  ;;  %1797 = vmatpush1.bf16.msra.mxu1 %v2527_v47 }
 0x16b   :  { %1799 = vmatprep.subr.bf16.mxu0 %v2435_v4  ;;  %1831 = vmatprep.subr.bf16.mxu1 %v2448_v22 }
 0x220   :  { %v362_v50 = vpop.f32.mrb[2].mxu0  ;;  %v433_v51 = vpop.f32.mrb[2].mxu1 }
 0x221   :  { %v438_v53 = vadd.f32 %v362_v50, %v292_v44  ;;  %v364_v54 = vpop.f32.mrb[3].mxu0  ;;  %v435_v56 = vpop.f32.mrb[3].mxu1  ;;  %v440_v5 = vadd.f32 %v433_v51, %v294_v2  ;;  %v470_v44 = vld [vmem:[#allocation4 + $0x48] sm:$0xff] }
 0x222   :  { %v439_v57 = vadd.f32 %v364_v54, %v293_v49  ;;  %v441_v63 = vadd.f32 %v435_v56, %v295_v61 }
 0x223   :  { %v1585_v59 = vmul.f32 -1.442695, %v438_v53 }
 0x224   :  { %v1586_v60 = vmul.f32 -1.442695, %v439_v57  ;;  %v1587_v3 = vmul.f32 -1.442695, %v441_v63  ;;  %v471_v63 = vld [vmem:[#allocation4 + $0x50] sm:$0xff] }
 0x225   :  { %2144 = vpow2.f32 %v1585_v59 }
 0x226   :  { %2146 = vpow2.f32 %v1586_v60  ;;  %v472_v60 = vld [vmem:[#allocation4 + $0x58] sm:$0xff] }
 0x227   :  { %2148 = vpow2.f32 %v1587_v3 }
 0x228   :  { %2150 = vtanh.f32 %v440_v5 }
 0x22f   :  { %v2145_v6 = vpop.eup %2144 }
 0x230   :  { %v2147_v11 = vpop.eup %2146  ;;  %v445_v12 = vadd.f32 1.0, %v2145_v6 }
 0x231   :  { %v451_v13 = vadd.f32 1.0, %v2147_v11  ;;  %v2149_v16 = vpop.eup %2148 }
 0x232   :  { %2152 = vrcp.f32 %v445_v12  ;;  %v2151_v19 = vpop.eup %2150  ;;  %v458_v28 = vadd.f32 1.0, %v2149_v16 }
 0x233   :  { %2154 = vrcp.f32 %v451_v13 }
 0x234   :  { %2156 = vrcp.f32 %v458_v28 }
 0x23c   :  { %v2153_v20 = vpop.eup %2152 }
 0x23d   :  { %v2155_v21 = vpop.eup %2154  ;;  %v462_v23 = vmul.f32 %v2153_v20, %v2151_v19 }
 0x23e   :  { %v461_v29 = vmul.f32 %v2155_v21, %v2569_v35  ;;  %v2157_v36 = vpop.eup %2156  ;;  %v469_v35 = vld [vmem:[#allocation4 + $0x40] sm:$0xff] }
 0x240   :  { %v2607_v34 = vadd.f32 %v462_v23, %v461_v29 }
 0x242   :  { %2158 = vtanh.f32 %v2607_v34 }
 0x24c   :  { %v2159_v38 = vpop.eup %2158 }
 0x24d   :  { %v465_v43 = vmul.f32 %v2159_v38, %v2157_v36 }
 0x24f   :  { %467 = vst [vmem:[#allocation9 + $0x8] sm:$0xff] %v465_v43  ;;  %538 = vmatmul.mubr.f32.vlgmr.msra.gmra.mrb[4].mxu0 %v465_v43  ;;  %609 = vmatmul.mubr.f32.vlgmr.msra.gmra.mrb[4].mxu1 %v465_v43 }
 0x250   :  { %1801 = vmatpush1.bf16.msra.mxu0 %v2437_v8  ;;  %1833 = vmatpush1.bf16.msra.mxu1 %v2450_v25 }
 0x251   :  { %1803 = vmatprep.subr.bf16.mxu0 %v2439_v9  ;;  %1835 = vmatprep.subr.bf16.mxu1 %v2460_v33 }
 0x252   :  { %714 = vmatprep.mubr.f32.mxu0 %v2378_v0  ;;  %785 = vmatprep.mubr.f32.mxu1 %v2378_v0 }
 0x254   :  { %1805 = vmatpush1.bf16.msra.mxu0 %v2443_v14  ;;  %1837 = vmatpush1.bf16.msra.mxu1 %v2462_v37 }
 0x255   :  { %1807 = vmatprep.subr.bf16.mxu0 %v2446_v17  ;;  %1839 = vmatprep.subr.bf16.mxu1 %v2468_v45 }
 0x258   :  { %1809 = vmatpush1.bf16.msra.mxu0 %v2453_v26  ;;  %1841 = vmatpush1.bf16.msra.mxu1 %v2474_v48 }
 0x259   :  { %1811 = vmatprep.subr.bf16.mxu0 %v2457_v30  ;;  %1843 = vmatprep.subr.bf16.mxu1 %v2477_v52 }
 0x25c   :  { %1813 = vmatpush1.bf16.msra.mxu0 %v2466_v42  ;;  %1845 = vmatpush1.bf16.msra.mxu1 %v2486_v62 }
 0x25d   :  { %1815 = vmatprep.subr.bf16.mxu0 %v2471_v46  ;;  %1847 = vmatprep.subr.bf16.mxu1 %v2489_v1 }
 0x260   :  { %1817 = vmatpush1.bf16.msra.mxu0 %v2480_v55  ;;  %1849 = vmatpush1.bf16.msra.mxu1 %v2498_v15 }
 0x261   :  { %1819 = vmatprep.subr.bf16.mxu0 %v2483_v58  ;;  %1851 = vmatprep.subr.bf16.mxu1 %v2501_v18 }
 0x264   :  { %1821 = vmatpush1.bf16.msra.mxu0 %v2492_v7  ;;  %1853 = vmatpush1.bf16.msra.mxu1 %v2510_v31 }
 0x265   :  { %1823 = vmatprep.subr.bf16.mxu0 %v2495_v10  ;;  %1855 = vmatprep.subr.bf16.mxu1 %v2513_v32 }
 0x268   :  { %1825 = vmatpush1.bf16.msra.mxu0 %v2504_v24  ;;  %1857 = vmatpush1.bf16.msra.mxu1 %v2520_v40 }
 0x269   :  { %1827 = vmatprep.subr.bf16.mxu0 %v2507_v27  ;;  %1859 = vmatprep.subr.bf16.mxu1 %v2523_v41 }
 0x26c   :  { %1829 = vmatpush1.bf16.msra.mxu0 %v2516_v39  ;;  %1861 = vmatpush1.bf16.msra.mxu1 %v2527_v47 }
 0x26d   :  { %1863 = vmatprep.subr.bf16.mxu0 %v2435_v4  ;;  %1895 = vmatprep.subr.bf16.mxu1 %v2448_v22 }
 0x322   :  { %v539_v49 = vpop.f32.mrb[4].mxu0  ;;  %v610_v50 = vpop.f32.mrb[4].mxu1 }
 0x323   :  { %v615_v51 = vadd.f32 %v539_v49, %v469_v35  ;;  %v541_v53 = vpop.f32.mrb[5].mxu0  ;;  %v612_v54 = vpop.f32.mrb[5].mxu1  ;;  %v617_v3 = vadd.f32 %v610_v50, %v471_v63  ;;  %v647_v35 = vld [vmem:[#allocation4 + $0x68] sm:$0xff] }
 0x324   :  { %v616_v56 = vadd.f32 %v541_v53, %v470_v44  ;;  %v618_v61 = vadd.f32 %v612_v54, %v472_v60 }
 0x325   :  { %v1588_v57 = vmul.f32 -1.442695, %v615_v51 }
 0x326   :  { %v1589_v59 = vmul.f32 -1.442695, %v616_v56  ;;  %v1590_v2 = vmul.f32 -1.442695, %v618_v61  ;;  %v648_v61 = vld [vmem:[#allocation4 + $0x70] sm:$0xff] }
 0x327   :  { %2160 = vpow2.f32 %v1588_v57 }
 0x328   :  { %2162 = vpow2.f32 %v1589_v59  ;;  %v649_v59 = vld [vmem:[#allocation4 + $0x78] sm:$0xff] }
 0x329   :  { %2164 = vpow2.f32 %v1590_v2 }
 0x32a   :  { %2166 = vtanh.f32 %v617_v3 }
 0x331   :  { %v2161_v5 = vpop.eup %2160 }
 0x332   :  { %v2163_v6 = vpop.eup %2162  ;;  %v622_v11 = vadd.f32 1.0, %v2161_v5 }
 0x333   :  { %v628_v12 = vadd.f32 1.0, %v2163_v6  ;;  %v2165_v13 = vpop.eup %2164 }
 0x334   :  { %2168 = vrcp.f32 %v622_v11  ;;  %v2167_v16 = vpop.eup %2166  ;;  %v635_v23 = vadd.f32 1.0, %v2165_v13 }
 0x335   :  { %2170 = vrcp.f32 %v628_v12 }
 0x336   :  { %2172 = vrcp.f32 %v635_v23 }
 0x33e   :  { %v2169_v19 = vpop.eup %2168 }
 0x33f   :  { %v2171_v20 = vpop.eup %2170  ;;  %v639_v21 = vmul.f32 %v2169_v19, %v2167_v16 }
 0x340   :  { %v638_v28 = vmul.f32 %v2171_v20, %v2607_v34  ;;  %v2173_v36 = vpop.eup %2172  ;;  %v646_v34 = vld [vmem:[#allocation4 + $0x60] sm:$0xff] }
 0x342   :  { %v2645_v29 = vadd.f32 %v639_v21, %v638_v28 }
 0x344   :  { %2174 = vtanh.f32 %v2645_v29 }
 0x34e   :  { %v2175_v38 = vpop.eup %2174 }
 0x34f   :  { %v642_v43 = vmul.f32 %v2175_v38, %v2173_v36 }
 0x351   :  { %644 = vst [vmem:[#allocation9 + $0x10] sm:$0xff] %v642_v43  ;;  %715 = vmatmul.mubr.f32.vlgmr.msra.gmra.mrb[6].mxu0 %v642_v43  ;;  %786 = vmatmul.mubr.f32.vlgmr.msra.gmra.mrb[6].mxu1 %v642_v43 }
 0x352   :  { %1865 = vmatpush1.bf16.msra.mxu0 %v2437_v8  ;;  %1897 = vmatpush1.bf16.msra.mxu1 %v2450_v25 }
 0x353   :  { %1867 = vmatprep.subr.bf16.mxu0 %v2439_v9  ;;  %1899 = vmatprep.subr.bf16.mxu1 %v2460_v33 }
 0x354   :  { %891 = vmatprep.mubr.f32.mxu0 %v2378_v0  ;;  %962 = vmatprep.mubr.f32.mxu1 %v2378_v0 }
 0x356   :  { %1869 = vmatpush1.bf16.msra.mxu0 %v2443_v14  ;;  %1901 = vmatpush1.bf16.msra.mxu1 %v2462_v37 }
 0x357   :  { %1871 = vmatprep.subr.bf16.mxu0 %v2446_v17  ;;  %1903 = vmatprep.subr.bf16.mxu1 %v2468_v45 }
 0x35a   :  { %1873 = vmatpush1.bf16.msra.mxu0 %v2453_v26  ;;  %1905 = vmatpush1.bf16.msra.mxu1 %v2474_v48 }
 0x35b   :  { %1875 = vmatprep.subr.bf16.mxu0 %v2457_v30  ;;  %1907 = vmatprep.subr.bf16.mxu1 %v2477_v52 }
 0x35e   :  { %1877 = vmatpush1.bf16.msra.mxu0 %v2466_v42  ;;  %1909 = vmatpush1.bf16.msra.mxu1 %v2486_v62 }
 0x35f   :  { %1879 = vmatprep.subr.bf16.mxu0 %v2471_v46  ;;  %1911 = vmatprep.subr.bf16.mxu1 %v2489_v1 }
 0x362   :  { %1881 = vmatpush1.bf16.msra.mxu0 %v2480_v55  ;;  %1913 = vmatpush1.bf16.msra.mxu1 %v2498_v15 }
 0x363   :  { %1883 = vmatprep.subr.bf16.mxu0 %v2483_v58  ;;  %1915 = vmatprep.subr.bf16.mxu1 %v2501_v18 }
 0x366   :  { %1885 = vmatpush1.bf16.msra.mxu0 %v2492_v7  ;;  %1917 = vmatpush1.bf16.msra.mxu1 %v2510_v31 }
 0x367   :  { %1887 = vmatprep.subr.bf16.mxu0 %v2495_v10  ;;  %1919 = vmatprep.subr.bf16.mxu1 %v2513_v32 }
 0x36a   :  { %1889 = vmatpush1.bf16.msra.mxu0 %v2504_v24  ;;  %1921 = vmatpush1.bf16.msra.mxu1 %v2520_v40 }
 0x36b   :  { %1891 = vmatprep.subr.bf16.mxu0 %v2507_v27  ;;  %1923 = vmatprep.subr.bf16.mxu1 %v2523_v41 }
 0x36e   :  { %1893 = vmatpush1.bf16.msra.mxu0 %v2516_v39  ;;  %1925 = vmatpush1.bf16.msra.mxu1 %v2527_v47 }
 0x36f   :  { %1927 = vmatprep.subr.bf16.mxu0 %v2435_v4  ;;  %1959 = vmatprep.subr.bf16.mxu1 %v2448_v22 }
 0x424   :  { %v716_v44 = vpop.f32.mrb[6].mxu0  ;;  %v787_v49 = vpop.f32.mrb[6].mxu1 }
 0x425   :  { %v792_v50 = vadd.f32 %v716_v44, %v646_v34  ;;  %v718_v51 = vpop.f32.mrb[7].mxu0  ;;  %v789_v53 = vpop.f32.mrb[7].mxu1  ;;  %v794_v2 = vadd.f32 %v787_v49, %v648_v61  ;;  %v824_v34 = vld [vmem:[#allocation4 + $0x88] sm:$0xff] }
 0x426   :  { %v793_v54 = vadd.f32 %v718_v51, %v647_v35  ;;  %v795_v60 = vadd.f32 %v789_v53, %v649_v59 }
 0x427   :  { %v1591_v56 = vmul.f32 -1.442695, %v792_v50 }
 0x428   :  { %v1592_v57 = vmul.f32 -1.442695, %v793_v54  ;;  %v1593_v63 = vmul.f32 -1.442695, %v795_v60  ;;  %v825_v60 = vld [vmem:[#allocation4 + $0x90] sm:$0xff] }
 0x429   :  { %2176 = vpow2.f32 %v1591_v56 }
 0x42a   :  { %2178 = vpow2.f32 %v1592_v57  ;;  %v826_v57 = vld [vmem:[#allocation4 + $0x98] sm:$0xff] }
 0x42b   :  { %2180 = vpow2.f32 %v1593_v63 }
 0x42c   :  { %2182 = vtanh.f32 %v794_v2 }
 0x433   :  { %v2177_v3 = vpop.eup %2176 }
 0x434   :  { %v2179_v5 = vpop.eup %2178  ;;  %v799_v6 = vadd.f32 1.0, %v2177_v3 }
 0x435   :  { %v805_v11 = vadd.f32 1.0, %v2179_v5  ;;  %v2181_v12 = vpop.eup %2180 }
 0x436   :  { %2184 = vrcp.f32 %v799_v6  ;;  %v2183_v13 = vpop.eup %2182  ;;  %v812_v21 = vadd.f32 1.0, %v2181_v12 }
 0x437   :  { %2186 = vrcp.f32 %v805_v11 }
 0x438   :  { %2188 = vrcp.f32 %v812_v21 }
 0x440   :  { %v2185_v16 = vpop.eup %2184 }
 0x441   :  { %v2187_v19 = vpop.eup %2186  ;;  %v816_v20 = vmul.f32 %v2185_v16, %v2183_v13 }
 0x442   :  { %v815_v23 = vmul.f32 %v2187_v19, %v2645_v29  ;;  %v2189_v36 = vpop.eup %2188  ;;  %v823_v29 = vld [vmem:[#allocation4 + $0x80] sm:$0xff] }
 0x444   :  { %v2683_v28 = vadd.f32 %v816_v20, %v815_v23 }
 0x446   :  { %2190 = vtanh.f32 %v2683_v28 }
 0x450   :  { %v2191_v38 = vpop.eup %2190 }
 0x451   :  { %v819_v43 = vmul.f32 %v2191_v38, %v2189_v36 }
 0x453   :  { %821 = vst [vmem:[#allocation9 + $0x18] sm:$0xff] %v819_v43  ;;  %892 = vmatmul.mubr.f32.vlgmr.msra.gmra.mrb[8].mxu0 %v819_v43  ;;  %963 = vmatmul.mubr.f32.vlgmr.msra.gmra.mrb[8].mxu1 %v819_v43 }
 0x454   :  { %1929 = vmatpush1.bf16.msra.mxu0 %v2437_v8  ;;  %1961 = vmatpush1.bf16.msra.mxu1 %v2450_v25 }
 0x455   :  { %1931 = vmatprep.subr.bf16.mxu0 %v2439_v9  ;;  %1963 = vmatprep.subr.bf16.mxu1 %v2460_v33 }
 0x456   :  { %1068 = vmatprep.mubr.f32.mxu0 %v2378_v0  ;;  %1139 = vmatprep.mubr.f32.mxu1 %v2378_v0 }
 0x458   :  { %1933 = vmatpush1.bf16.msra.mxu0 %v2443_v14  ;;  %1965 = vmatpush1.bf16.msra.mxu1 %v2462_v37 }
 0x459   :  { %1935 = vmatprep.subr.bf16.mxu0 %v2446_v17  ;;  %1967 = vmatprep.subr.bf16.mxu1 %v2468_v45 }
 0x45c   :  { %1937 = vmatpush1.bf16.msra.mxu0 %v2453_v26  ;;  %1969 = vmatpush1.bf16.msra.mxu1 %v2474_v48 }
 0x45d   :  { %1939 = vmatprep.subr.bf16.mxu0 %v2457_v30  ;;  %1971 = vmatprep.subr.bf16.mxu1 %v2477_v52 }
 0x460   :  { %1941 = vmatpush1.bf16.msra.mxu0 %v2466_v42  ;;  %1973 = vmatpush1.bf16.msra.mxu1 %v2486_v62 }
 0x461   :  { %1943 = vmatprep.subr.bf16.mxu0 %v2471_v46  ;;  %1975 = vmatprep.subr.bf16.mxu1 %v2489_v1 }
 0x464   :  { %1945 = vmatpush1.bf16.msra.mxu0 %v2480_v55  ;;  %1977 = vmatpush1.bf16.msra.mxu1 %v2498_v15 }
 0x465   :  { %1947 = vmatprep.subr.bf16.mxu0 %v2483_v58  ;;  %1979 = vmatprep.subr.bf16.mxu1 %v2501_v18 }
 0x468   :  { %1949 = vmatpush1.bf16.msra.mxu0 %v2492_v7  ;;  %1981 = vmatpush1.bf16.msra.mxu1 %v2510_v31 }
 0x469   :  { %1951 = vmatprep.subr.bf16.mxu0 %v2495_v10  ;;  %1983 = vmatprep.subr.bf16.mxu1 %v2513_v32 }
 0x46c   :  { %1953 = vmatpush1.bf16.msra.mxu0 %v2504_v24  ;;  %1985 = vmatpush1.bf16.msra.mxu1 %v2520_v40 }
 0x46d   :  { %1955 = vmatprep.subr.bf16.mxu0 %v2507_v27  ;;  %1987 = vmatprep.subr.bf16.mxu1 %v2523_v41 }
 0x470   :  { %1957 = vmatpush1.bf16.msra.mxu0 %v2516_v39  ;;  %1989 = vmatpush1.bf16.msra.mxu1 %v2527_v47 }
 0x471   :  { %1991 = vmatprep.subr.bf16.mxu0 %v2435_v4  ;;  %2023 = vmatprep.subr.bf16.mxu1 %v2448_v22 }
 0x526   :  { %v893_v35 = vpop.f32.mrb[8].mxu0  ;;  %v964_v44 = vpop.f32.mrb[8].mxu1 }
 0x527   :  { %v969_v49 = vadd.f32 %v893_v35, %v823_v29  ;;  %v895_v50 = vpop.f32.mrb[9].mxu0  ;;  %v966_v51 = vpop.f32.mrb[9].mxu1  ;;  %v971_v63 = vadd.f32 %v964_v44, %v825_v60  ;;  %v1001_v29 = vld [vmem:[#allocation4 + $0xa8] sm:$0xff] }
 0x528   :  { %v970_v53 = vadd.f32 %v895_v50, %v824_v34  ;;  %v972_v59 = vadd.f32 %v966_v51, %v826_v57 }
 0x529   :  { %v1594_v54 = vmul.f32 -1.442695, %v969_v49 }
 0x52a   :  { %v1595_v56 = vmul.f32 -1.442695, %v970_v53  ;;  %v1596_v61 = vmul.f32 -1.442695, %v972_v59  ;;  %v1002_v59 = vld [vmem:[#allocation4 + $0xb0] sm:$0xff] }
 0x52b   :  { %2192 = vpow2.f32 %v1594_v54 }
 0x52c   :  { %2194 = vpow2.f32 %v1595_v56  ;;  %v1003_v56 = vld [vmem:[#allocation4 + $0xb8] sm:$0xff] }
 0x52d   :  { %2196 = vpow2.f32 %v1596_v61 }
 0x52e   :  { %2198 = vtanh.f32 %v971_v63 }
 0x535   :  { %v2193_v2 = vpop.eup %2192 }
 0x536   :  { %v2195_v3 = vpop.eup %2194  ;;  %v976_v5 = vadd.f32 1.0, %v2193_v2 }
 0x537   :  { %v982_v6 = vadd.f32 1.0, %v2195_v3  ;;  %v2197_v11 = vpop.eup %2196 }
 0x538   :  { %2200 = vrcp.f32 %v976_v5  ;;  %v2199_v12 = vpop.eup %2198  ;;  %v989_v20 = vadd.f32 1.0, %v2197_v11 }
 0x539   :  { %2202 = vrcp.f32 %v982_v6 }
 0x53a   :  { %2204 = vrcp.f32 %v989_v20 }
 0x542   :  { %v2201_v13 = vpop.eup %2200 }
 0x543   :  { %v2203_v16 = vpop.eup %2202  ;;  %v993_v19 = vmul.f32 %v2201_v13, %v2199_v12 }
 0x544   :  { %v992_v21 = vmul.f32 %v2203_v16, %v2683_v28  ;;  %v2205_v36 = vpop.eup %2204  ;;  %v1000_v28 = vld [vmem:[#allocation4 + $0xa0] sm:$0xff] }
 0x546   :  { %v2721_v23 = vadd.f32 %v993_v19, %v992_v21 }
 0x548   :  { %2206 = vtanh.f32 %v2721_v23 }
 0x552   :  { %v2207_v38 = vpop.eup %2206 }
 0x553   :  { %v996_v43 = vmul.f32 %v2207_v38, %v2205_v36 }
 0x555   :  { %998 = vst [vmem:[#allocation9 + $0x20] sm:$0xff] %v996_v43  ;;  %1069 = vmatmul.mubr.f32.vlgmr.msra.gmra.mrb[10].mxu0 %v996_v43  ;;  %1140 = vmatmul.mubr.f32.vlgmr.msra.gmra.mrb[10].mxu1 %v996_v43 }
 0x556   :  { %1993 = vmatpush1.bf16.msra.mxu0 %v2437_v8  ;;  %2025 = vmatpush1.bf16.msra.mxu1 %v2450_v25 }
 0x557   :  { %1995 = vmatprep.subr.bf16.mxu0 %v2439_v9  ;;  %2027 = vmatprep.subr.bf16.mxu1 %v2460_v33 }
 0x558   :  { %1245 = vmatprep.mubr.f32.mxu0 %v2378_v0  ;;  %1316 = vmatprep.mubr.f32.mxu1 %v2378_v0 }
 0x55a   :  { %1997 = vmatpush1.bf16.msra.mxu0 %v2443_v14  ;;  %2029 = vmatpush1.bf16.msra.mxu1 %v2462_v37 }
 0x55b   :  { %1999 = vmatprep.subr.bf16.mxu0 %v2446_v17  ;;  %2031 = vmatprep.subr.bf16.mxu1 %v2468_v45 }
 0x55e   :  { %2001 = vmatpush1.bf16.msra.mxu0 %v2453_v26  ;;  %2033 = vmatpush1.bf16.msra.mxu1 %v2474_v48 }
 0x55f   :  { %2003 = vmatprep.subr.bf16.mxu0 %v2457_v30  ;;  %2035 = vmatprep.subr.bf16.mxu1 %v2477_v52 }
 0x562   :  { %2005 = vmatpush1.bf16.msra.mxu0 %v2466_v42  ;;  %2037 = vmatpush1.bf16.msra.mxu1 %v2486_v62 }
 0x563   :  { %2007 = vmatprep.subr.bf16.mxu0 %v2471_v46  ;;  %2039 = vmatprep.subr.bf16.mxu1 %v2489_v1 }
 0x566   :  { %2009 = vmatpush1.bf16.msra.mxu0 %v2480_v55  ;;  %2041 = vmatpush1.bf16.msra.mxu1 %v2498_v15 }
 0x567   :  { %2011 = vmatprep.subr.bf16.mxu0 %v2483_v58  ;;  %2043 = vmatprep.subr.bf16.mxu1 %v2501_v18 }
 0x56a   :  { %2013 = vmatpush1.bf16.msra.mxu0 %v2492_v7  ;;  %2045 = vmatpush1.bf16.msra.mxu1 %v2510_v31 }
 0x56b   :  { %2015 = vmatprep.subr.bf16.mxu0 %v2495_v10  ;;  %2047 = vmatprep.subr.bf16.mxu1 %v2513_v32 }
 0x56e   :  { %2017 = vmatpush1.bf16.msra.mxu0 %v2504_v24  ;;  %2049 = vmatpush1.bf16.msra.mxu1 %v2520_v40 }
 0x56f   :  { %2019 = vmatprep.subr.bf16.mxu0 %v2507_v27  ;;  %2051 = vmatprep.subr.bf16.mxu1 %v2523_v41 }
 0x572   :  { %2021 = vmatpush1.bf16.msra.mxu0 %v2516_v39  ;;  %2053 = vmatpush1.bf16.msra.mxu1 %v2527_v47 }
 0x573   :  { %2055 = vmatprep.subr.bf16.mxu0 %v2435_v4  ;;  %2087 = vmatprep.subr.bf16.mxu1 %v2448_v22 }
 0x628   :  { %v1070_v34 = vpop.f32.mrb[10].mxu0  ;;  %v1141_v35 = vpop.f32.mrb[10].mxu1 }
 0x629   :  { %v1146_v44 = vadd.f32 %v1070_v34, %v1000_v28  ;;  %v1072_v49 = vpop.f32.mrb[11].mxu0  ;;  %v1143_v50 = vpop.f32.mrb[11].mxu1  ;;  %v1148_v61 = vadd.f32 %v1141_v35, %v1002_v59 }
 0x62a   :  { %v1147_v51 = vadd.f32 %v1072_v49, %v1001_v29  ;;  %v1149_v57 = vadd.f32 %v1143_v50, %v1003_v56  ;;  %v1357_v50 = vld [vmem:[#allocation4 + $0xf8] sm:$0xff] }
 0x62b   :  { %v1597_v53 = vmul.f32 -1.442695, %v1146_v44 }
 0x62c   :  { %v1598_v54 = vmul.f32 -1.442695, %v1147_v51  ;;  %v1599_v60 = vmul.f32 -1.442695, %v1149_v57 }
 0x62d   :  { %2208 = vpow2.f32 %v1597_v53  ;;  %v1356_v53 = vld [vmem:[#allocation4 + $0xf0] sm:$0xff] }
 0x62e   :  { %2210 = vpow2.f32 %v1598_v54 }
 0x62f   :  { %2212 = vpow2.f32 %v1599_v60 }
 0x630   :  { %2214 = vtanh.f32 %v1148_v61 }
 0x637   :  { %v2209_v4 = vpop.eup %2208 }
 0x638   :  { %v2211_v63 = vpop.eup %2210  ;;  %v1153_v22 = vadd.f32 1.0, %v2209_v4 }
 0x639   :  { %v1159_v2 = vadd.f32 1.0, %v2211_v63  ;;  %v2213_v3 = vpop.eup %2212 }
 0x63a   :  { %2216 = vrcp.f32 %v1153_v22  ;;  %v2215_v5 = vpop.eup %2214  ;;  %v1166_v13 = vadd.f32 1.0, %v2213_v3 }
 0x63b   :  { %2218 = vrcp.f32 %v1159_v2 }
 0x63c   :  { %2220 = vrcp.f32 %v1166_v13 }
 0x644   :  { %v2217_v6 = vpop.eup %2216 }
 0x645   :  { %v2219_v11 = vpop.eup %2218  ;;  %v1170_v12 = vmul.f32 %v2217_v6, %v2215_v5 }
 0x646   :  { %v1169_v16 = vmul.f32 %v2219_v11, %v2721_v23  ;;  %v2221_v20 = vpop.eup %2220  ;;  %v1355_v23 = vld [vmem:[#allocation4 + $0xe8] sm:$0xff] }
 0x648   :  { %v2759_v19 = vadd.f32 %v1170_v12, %v1169_v16 }
 0x64a   :  { %2222 = vtanh.f32 %v2759_v19 }
 0x654   :  { %v2223_v21 = vpop.eup %2222 }
 0x655   :  { %v1173_v36 = vmul.f32 %v2223_v21, %v2221_v20 }
 0x657   :  { %1175 = vst [vmem:[#allocation9 + $0x28] sm:$0xff] %v1173_v36  ;;  %1246 = vmatmul.mubr.f32.vlgmr.msra.gmra.mrb[12].mxu0 %v1173_v36  ;;  %1317 = vmatmul.mubr.f32.vlgmr.msra.gmra.mrb[12].mxu1 %v1173_v36 }
 0x658   :  { %2057 = vmatpush1.bf16.msra.mxu0 %v2437_v8  ;;  %2089 = vmatpush1.bf16.msra.mxu1 %v2450_v25  ;;  %v1178_v8 = vld [vmem:[#allocation4 + $0xc8] sm:$0xff] }
 0x659   :  { %2059 = vmatprep.subr.bf16.mxu0 %v2439_v9  ;;  %2091 = vmatprep.subr.bf16.mxu1 %v2460_v33 }
 0x65a   :  { %1422 = vmatprep.mubr.f32.mxu0 %v2378_v0  ;;  %1493 = vmatprep.mubr.f32.mxu1 %v2378_v0  ;;  %v1177_v0 = vld [vmem:[#allocation4 + $0xc0] sm:$0xff] }
 0x65c   :  { %2061 = vmatpush1.bf16.msra.mxu0 %v2443_v14  ;;  %2093 = vmatpush1.bf16.msra.mxu1 %v2462_v37 }
 0x65d   :  { %2063 = vmatprep.subr.bf16.mxu0 %v2446_v17  ;;  %2095 = vmatprep.subr.bf16.mxu1 %v2468_v45 }
 0x660   :  { %2065 = vmatpush1.bf16.msra.mxu0 %v2453_v26  ;;  %2097 = vmatpush1.bf16.msra.mxu1 %v2474_v48 }
 0x661   :  { %2067 = vmatprep.subr.bf16.mxu0 %v2457_v30  ;;  %2099 = vmatprep.subr.bf16.mxu1 %v2477_v52 }
 0x664   :  { %2069 = vmatpush1.bf16.msra.mxu0 %v2466_v42  ;;  %2101 = vmatpush1.bf16.msra.mxu1 %v2486_v62  ;;  %v1180_v42 = vld [vmem:[#allocation4 + $0xd8] sm:$0xff] }
 0x665   :  { %2071 = vmatprep.subr.bf16.mxu0 %v2471_v46  ;;  %2103 = vmatprep.subr.bf16.mxu1 %v2489_v1  ;;  %v1179_v46 = vld [vmem:[#allocation4 + $0xd0] sm:$0xff] }
 0x668   :  { %2073 = vmatpush1.bf16.msra.mxu0 %v2480_v55  ;;  %2105 = vmatpush1.bf16.msra.mxu1 %v2498_v15 }
 0x669   :  { %2075 = vmatprep.subr.bf16.mxu0 %v2483_v58  ;;  %2107 = vmatprep.subr.bf16.mxu1 %v2501_v18 }
 0x66c   :  { %2077 = vmatpush1.bf16.msra.mxu0 %v2492_v7  ;;  %2109 = vmatpush1.bf16.msra.mxu1 %v2510_v31 }
 0x66d   :  { %2079 = vmatprep.subr.bf16.mxu0 %v2495_v10  ;;  %2111 = vmatprep.subr.bf16.mxu1 %v2513_v32 }
 0x670   :  { %2081 = vmatpush1.bf16.msra.mxu0 %v2504_v24  ;;  %2113 = vmatpush1.bf16.msra.mxu1 %v2520_v40 }
 0x671   :  { %2083 = vmatprep.subr.bf16.mxu0 %v2507_v27  ;;  %2115 = vmatprep.subr.bf16.mxu1 %v2523_v41 }
 0x674   :  { %2085 = vmatpush1.bf16.msra.mxu0 %v2516_v39  ;;  %2117 = vmatpush1.bf16.msra.mxu1 %v2527_v47  ;;  %v1354_v47 = vld [vmem:[#allocation4 + $0xe0] sm:$0xff] }
 0x72a   :  { %v1247_v9 = vpop.f32.mrb[12].mxu0  ;;  %v1318_v14 = vpop.f32.mrb[12].mxu1 }
 0x72b   :  { %v1323_v17 = vadd.f32 %v1247_v9, %v1177_v0  ;;  %v1249_v25 = vpop.f32.mrb[13].mxu0  ;;  %v1320_v26 = vpop.f32.mrb[13].mxu1  ;;  %v1325_v52 = vadd.f32 %v1318_v14, %v1179_v46 }
 0x72c   :  { %v1324_v30 = vadd.f32 %v1249_v25, %v1178_v8  ;;  %v1326_v45 = vadd.f32 %v1320_v26, %v1180_v42 }
 0x72d   :  { %v1600_v33 = vmul.f32 -1.442695, %v1323_v17 }
 0x72e   :  { %v1601_v37 = vmul.f32 -1.442695, %v1324_v30  ;;  %v1602_v48 = vmul.f32 -1.442695, %v1326_v45 }
 0x72f   :  { %2224 = vpow2.f32 %v1600_v33 }
 0x730   :  { %2226 = vpow2.f32 %v1601_v37 }
 0x731   :  { %2228 = vpow2.f32 %v1602_v48 }
 0x732   :  { %2230 = vtanh.f32 %v1325_v52 }
 0x739   :  { %v2225_v55 = vpop.eup %2224 }
 0x73a   :  { %v2227_v58 = vpop.eup %2226  ;;  %v1330_v62 = vadd.f32 1.0, %v2225_v55 }
 0x73b   :  { %v1336_v1 = vadd.f32 1.0, %v2227_v58  ;;  %v2229_v7 = vpop.eup %2228 }
 0x73c   :  { %2232 = vrcp.f32 %v1330_v62  ;;  %v2231_v10 = vpop.eup %2230  ;;  %v1343_v27 = vadd.f32 1.0, %v2229_v7 }
 0x73d   :  { %2234 = vrcp.f32 %v1336_v1 }
 0x73e   :  { %2236 = vrcp.f32 %v1343_v27 }
 0x746   :  { %v2233_v15 = vpop.eup %2232 }
 0x747   :  { %v2235_v18 = vpop.eup %2234  ;;  %v1347_v24 = vmul.f32 %v2233_v15, %v2231_v10 }
 0x748   :  { %v1346_v31 = vmul.f32 %v2235_v18, %v2759_v19  ;;  %v2237_v39 = vpop.eup %2236 }
 0x74a   :  { %v1348_v32 = vadd.f32 %v1347_v24, %v1346_v31 }
 0x74c   :  { %2238 = vtanh.f32 %v1348_v32 }
 0x756   :  { %v2239_v40 = vpop.eup %2238 }
 0x757   :  { %v1350_v41 = vmul.f32 %v2239_v40, %v2237_v39 }
 0x759   :  { %1352 = vst [vmem:[#allocation9 + $0x30] sm:$0xff] %v1350_v41  ;;  %1423 = vmatmul.mubr.f32.vlgmr.msra.gmra.mrb[14].mxu0 %v1350_v41  ;;  %1494 = vmatmul.mubr.f32.vlgmr.msra.gmra.mrb[14].mxu1 %v1350_v41 }
 0x82c   :  { %v1424_v38 = vpop.f32.mrb[14].mxu0  ;;  %v1495_v43 = vpop.f32.mrb[14].mxu1 }
 0x82d   :  { %v1500_v28 = vadd.f32 %v1424_v38, %v1354_v47  ;;  %v1426_v29 = vpop.f32.mrb[15].mxu0  ;;  %v1497_v34 = vpop.f32.mrb[15].mxu1  ;;  %v1502_v56 = vadd.f32 %v1495_v43, %v1356_v53 }
 0x82e   :  { %v1501_v35 = vadd.f32 %v1426_v29, %v1355_v23  ;;  %v1503_v51 = vadd.f32 %v1497_v34, %v1357_v50 }
 0x82f   :  { %v1603_v44 = vmul.f32 -1.442695, %v1500_v28 }
 0x830   :  { %v1604_v49 = vmul.f32 -1.442695, %v1501_v35  ;;  %v1605_v54 = vmul.f32 -1.442695, %v1503_v51 }
 0x831   :  { %2240 = vpow2.f32 %v1603_v44 }
 0x832   :  { %2242 = vpow2.f32 %v1604_v49 }
 0x833   :  { %2244 = vpow2.f32 %v1605_v54 }
 0x834   :  { %2246 = vtanh.f32 %v1502_v56 }
 0x83b   :  { %v2241_v57 = vpop.eup %2240 }
 0x83c   :  { %v2243_v59 = vpop.eup %2242  ;;  %v1507_v60 = vadd.f32 1.0, %v2241_v57 }
 0x83d   :  { %v1513_v61 = vadd.f32 1.0, %v2243_v59  ;;  %v2245_v4 = vpop.eup %2244 }
 0x83e   :  { %2248 = vrcp.f32 %v1507_v60  ;;  %v2247_v63 = vpop.eup %2246  ;;  %v1520_v5 = vadd.f32 1.0, %v2245_v4 }
 0x83f   :  { %2250 = vrcp.f32 %v1513_v61 }
 0x840   :  { %2252 = vrcp.f32 %v1520_v5 }
 0x848   :  { %v2249_v22 = vpop.eup %2248 }
 0x849   :  { %v2251_v2 = vpop.eup %2250  ;;  %v1524_v3 = vmul.f32 %v2249_v22, %v2247_v63 }
 0x84a   :  { %v1523_v6 = vmul.f32 %v2251_v2, %v1348_v32  ;;  %v2253_v12 = vpop.eup %2252 }
 0x84c   :  { %v1525_v11 = vadd.f32 %v1524_v3, %v1523_v6 }
 0x84e   :  { %2254 = vtanh.f32 %v1525_v11  ;;  %1536 = vst [vmem:[#allocation12] sm:$0xff] %v1525_v11 }
 0x858   :  { %v2255_v13 = vpop.eup %2254 }
 0x859   :  { %v1527_v16 = vmul.f32 %v2255_v13, %v2253_v12 }
 0x85b   :  { %1529 = vst [vmem:[#allocation9 + $0x38] sm:$0xff] %v1527_v16  ;;  %1535 = vst [vmem:[#allocation10] sm:$0xff] %v1527_v16 }
 0x85c   :  { %2311 = shalt.err (!%p2308_p6)
}
 0x85d   :  { %s2312_s22 = scalar_lea.hbm %s2848_s3, 128 }
 0x85e   :  { %p2313_p7 = scmp.ne.s32.totalorder %s2848_s3, %s2312_s22  ;;  %p2316_p8 = scmp.lt.u32.totalorder %s2312_s22, %s2848_s3 }
 0x860   :  { %p2318_p9 = pnand %p2316_p8, %p2313_p7 }
 0x862   :  { %2321 = shalt.err (!%p2318_p9)
}
 0x863   :  { %1558 = dma.vmem_to_hbm [thread:$0]  %s1556_s14, 128, %s2848_s3, [#allocation11]  }
 0x864   :  { %s2322_s29 = scalar_lea.vmem %s2795_s16, 1024  ;;  %p2327_p11 = scmp.lt.s32.totalorder %s2795_s16, %s2795_s16 }
 0x865   :  { %p2323_p10 = scmp.ne.s32.totalorder %s2795_s16, %s2322_s29  ;;  %p2328_p12 = scmp.lt.s32.totalorder %s2322_s29, %s2322_s29 }
 0x867   :  { %p2329_p13 = por %p2328_p12, %p2327_p11 }
 0x869   :  { %p2330_p0 = pnand %p2329_p13, %p2323_p10 }
 0x86b   :  { %2333 = shalt.err (!%p2330_p0)
}
 0x86c   :  { %s2334_s6 = scalar_lea.hbm %s2847_s2, 1024 }
 0x86d   :  { %p2335_p1 = scmp.ne.s32.totalorder %s2847_s2, %s2334_s6  ;;  %p2338_p2 = scmp.lt.u32.totalorder %s2334_s6, %s2847_s2 }
 0x86f   :  { %p2340_p3 = pnand %p2338_p2, %p2335_p1 }
 0x871   :  { %2343 = shalt.err (!%p2340_p3)
}
 0x872   :  { %s2382_s3 = smov 128   ;;  %s2383_s11 = smov 8  }
 0x873   :  { %1548 = dma.vmem_to_hbm [thread:$0]  %s2795_s16, 1024, %s2847_s2, [#allocation6], %s2382_s3, %s2382_s3, %s2383_s11  }
 0x874   :  { %s2344_s13 = scalar_lea.vmem %s2797_s18, 128  ;;  %p2349_p5 = scmp.lt.s32.totalorder %s2797_s18, %s2797_s18 }
 0x875   :  { %p2345_p4 = scmp.ne.s32.totalorder %s2797_s18, %s2344_s13  ;;  %p2350_p6 = scmp.lt.s32.totalorder %s2344_s13, %s2344_s13 }
 0x877   :  { %p2351_p7 = por %p2350_p6, %p2349_p5 }
 0x879   :  { %p2352_p8 = pnand %p2351_p7, %p2345_p4 }
 0x87b   :  { %2355 = shalt.err (!%p2352_p8)
}
 0x87c   :  { %s2356_s15 = scalar_lea.hbm %s2849_s4, 128 }
 0x87d   :  { %p2357_p9 = scmp.ne.s32.totalorder %s2849_s4, %s2356_s15  ;;  %p2360_p10 = scmp.lt.u32.totalorder %s2356_s15, %s2849_s4 }
 0x87f   :  { %p2362_p11 = pnand %p2360_p10, %p2357_p9 }
 0x881   :  { %2365 = shalt.err (!%p2362_p11)
}
 0x882   :  { %1568 = dma.vmem_to_hbm [thread:$0]  %s2797_s18, 128, %s2849_s4, [#allocation11]  }
 0x883   :  { %2370 = dma.done.wait [#allocation6], 1024  }
 0x884   :  { %2371 = vsyncadd [#allocation6], 4294966272 }
 0x885   :  { %2372 = dma.done.wait [#allocation11], 256  }
 0x886   :  { %2373 = vsyncadd [#allocation11], 4294967040 }
 0x887   :  { %1578 = vsyncpa [#allocation5], 1 }
 0x888   :  { %1579 = vsyncpa [#allocation8], 1 }
 0x889   :  { %1580 = vsyncpa [#allocation6], 1 }
 0x88a   :  { %1581 = vsyncpa [#allocation11], 1 }

</bundles_post_ra>
